<compile_context>
chip_gen: v7x
topology: tpu7x:2x2x1
jax: 0.10.0
libtpu: 0.0.40
codegen_flags: <defaults>
</compile_context>

<pallas_src>
import jax
import jax.numpy as jnp
from jax.experimental import pallas as pl
from jax.experimental.pallas import tpu as pltpu

_LANE = 128
# Safe under v5e's 16 MiB scoped-VMEM default and v7x's halved (64 MiB) VMEM.
_VMEM_BUDGET_BYTES = 8 * 1024 * 1024


def _rowscale_mul_kernel(scale_ref, x_ref, o_ref):
    # scale_ref: (TILE_R, 1)  -- lane-broadcast multiply on the VPU.
    # x_ref / o_ref: (TILE_R, HW)
    o_ref[...] = x_ref[...] * scale_ref[...]


def _sublane_multiple(dtype):
    # Sub-32-bit dtypes pack along sublanes: 8 for f32, 16 for bf16, 32 for i8.
    return max(8, 32 // jnp.dtype(dtype).itemsize)


def _pick_row_tile(rows, hw, dtype, budget_bytes=_VMEM_BUDGET_BYTES):
    """Row-tile size derived from a padded-byte VMEM budget.

    Accounts for lane padding (hw rounds up to a multiple of 128 lanes in
    VMEM) and double-buffering of the input + output blocks plus the padded
    (tile_r, 1) scale block.  If the whole slab fits, use one block: for small
    layers the ~0.35 us per-grid-step overhead exceeds the HBM roofline time.
    """
    itemsize = jnp.dtype(dtype).itemsize
    padded_lanes = -(-hw // _LANE) * _LANE
    # (in + out) blocks double-buffered + double-buffered padded scale block.
    bytes_per_row = padded_lanes * itemsize * 4 + _LANE * itemsize * 2
    max_rows = max(int(budget_bytes // bytes_per_row), 1)
    if rows <= max_rows:
        return rows  # single full block (block == full dim is always legal)

    sub = _sublane_multiple(dtype)
    cap = max((max_rows // sub) * sub, sub)
    # Prefer exact divisors of `rows` (no masked boundary block).  If the
    # largest one gives an odd step count, accept up to 2x more steps to get
    # an even split across v7x's two TensorCores ("parallel" grid axis).
    divisors = [t for t in range(sub, cap + 1, sub) if rows % t == 0]
    if divisors:
        best = max(divisors)
        if (rows // best) % 2 != 0:
            even = [t for t in divisors if (rows // t) % 2 == 0 and 2 * t >= best]
            if even:
                best = max(even)
        return best
    # Ragged fallback: Pallas masks the partial boundary block.  The padding
    # garbage in the partial scale block is multiplied but never stored.
    return cap


def broadcast_channel_mul(x316, x311):
    """x316 * x311 with PyTorch broadcasting semantics.

    x316: (N, C, 1, 1), x311: (N, C, H, W) -> (N, C, H, W)
    """
    N, C, H, W = x311.shape
    assert x316.shape == (N, C, 1, 1)

    rows = N * C
    hw = H * W

    # Zero-copy (row-major) reshapes: no HBM transpose traffic.  Batch > 1 is
    # handled because the row index is n*C + c for both the slab and the scale.
    x_slab = x311.reshape(rows, hw)
    scale_slab = x316.reshape(rows, 1)

    tile_r = _pick_row_tile(rows, hw, x311.dtype)
    grid = (pl.cdiv(rows, tile_r),)

    out_slab = pl.pallas_call(
        _rowscale_mul_kernel,
        out_shape=jax.ShapeDtypeStruct((rows, hw), x311.dtype),
        grid_spec=pltpu.PrefetchScalarGridSpec(
            num_scalar_prefetch=0,
            grid=grid,
            in_specs=[
                pl.BlockSpec((tile_r, 1), lambda i: (i, 0)),   # per-row scale
                pl.BlockSpec((tile_r, hw), lambda i: (i, 0)),  # feature rows
            ],
            out_specs=pl.BlockSpec((tile_r, hw), lambda i: (i, 0)),
        ),
        compiler_params=pltpu.CompilerParams(
            dimension_semantics=("parallel",),  # megacore-shardable if multi-step
        ),
    )(scale_slab, x_slab)

    return out_slab.reshape(N, C, H, W)


if __name__ == "__main__":
    key = jax.random.PRNGKey(0)
    k1, k2 = jax.random.split(key)

    # Shapes from the module's forward (already small).
    N, C, H, W = 1, 1392, 7, 7
    x311 = jax.random.normal(k1, (N, C, H, W), dtype=jnp.float32)
    x316 = jax.random.normal(k2, (N, C, 1, 1), dtype=jnp.float32)

    out = broadcast_channel_mul(x316, x311)
    out = jax.block_until_ready(out)

    # Reference: plain JAX broadcasting == PyTorch broadcasting here.
    ref = x316 * x311
    assert out.shape == (N, C, H, W)
    assert jnp.allclose(out, ref, atol=1e-6, rtol=1e-6)

    print("KERNEL_OK")
</pallas_src>

<mosaic_0001>
module attributes {stable_mosaic.version = 11 : i64} {
  func.func @_rowscale_mul_kernel(%arg0: i32, %arg1: memref<1392x1xf32, #tpu.memory_space<vmem>>, %arg2: memref<1392x49xf32, #tpu.memory_space<vmem>>, %arg3: memref<1392x49xf32, #tpu.memory_space<vmem>>) attributes {dimension_semantics = [#tpu.dimension_semantics<parallel>], iteration_bounds = array<i64: 1>, scalar_prefetch = 0 : i64, scratch_operands = 0 : i64, tpu.core_type = #tpu.core_type<tc>, window_params = [{transform_indices = @transform_0, window_bounds = array<i64: 1392, 1>}, {transform_indices = @transform_1, window_bounds = array<i64: 1392, 49>}, {transform_indices = @transform_2, window_bounds = array<i64: 1392, 49>}]} {
    %c0 = arith.constant 0 : index
    %c0_0 = arith.constant 0 : index
    %0 = vector.load %arg2[%c0, %c0_0] : memref<1392x49xf32, #tpu.memory_space<vmem>>, vector<1392x49xf32>
    %c0_1 = arith.constant 0 : index
    %c0_2 = arith.constant 0 : index
    %1 = vector.load %arg1[%c0_1, %c0_2] : memref<1392x1xf32, #tpu.memory_space<vmem>>, vector<1392x1xf32>
    %2 = vector.broadcast %1 : vector<1392x1xf32> to vector<1392x49xf32>
    %3 = arith.mulf %0, %2 : vector<1392x49xf32>
    %c0_3 = arith.constant 0 : index
    %c0_4 = arith.constant 0 : index
    %4 = vector.load %arg3[%c0_3, %c0_4] : memref<1392x49xf32, #tpu.memory_space<vmem>>, vector<1392x49xf32>
    tpu.vector_store %arg3[%c0_3, %c0_4], %3 {strides = array<i32>} : memref<1392x49xf32, #tpu.memory_space<vmem>>, vector<1392x49xf32>,
    return
  }
  func.func @transform_0(%arg0: i32) -> (i32, i32) {
    %c0_i32 = arith.constant 0 : i32
    %c0_i32_0 = arith.constant 0 : i32
    return %arg0, %c0_i32 : i32, i32
  }
  func.func @transform_1(%arg0: i32) -> (i32, i32) {
    %c0_i32 = arith.constant 0 : i32
    %c0_i32_0 = arith.constant 0 : i32
    return %arg0, %c0_i32 : i32, i32
  }
  func.func @transform_2(%arg0: i32) -> (i32, i32) {
    %c0_i32 = arith.constant 0 : i32
    %c0_i32_0 = arith.constant 0 : i32
    return %arg0, %c0_i32 : i32, i32
  }
}

</mosaic_0001>

<bundles_post_ra>
// kernel: tpu_custom_call.1
= control target key start
LH: loop header
LB: loop body
LE: loop exit
PB: predicated region body
PF: predicated region fallthrough
CT: control target
= control target key end

     0   :  { %v1585_v0 = vmov 0   ;;  %vm1403_vm0 = vcmask 400384   ;;  %s3341_s0 = inlined_call_operand.vmem [shape: f32[1392,1], index: 0, kind: input, shape index: {}]   ;;  %s3342_s1 = inlined_call_operand.vmem [shape: f32[1392,49], index: 1, kind: input, shape index: {}]   ;;  %s3343_s2 = inlined_call_operand.vmem [shape: f32[1392,49], index: 2, kind: output, shape index: {}]  }
   0x1   :  { %1584 = vset.pattern.permute.xlu1 %v1585_v0  ;;  %1583 = vset.pattern.permute.xlu0 %v1585_v0  ;;  %v187_v1 = vld [vmem:[%s3341_s0 + $0x10] sm:$0xff]  ;;  %v185_v2 = vld [vmem:[%s3341_s0] sm:$0xff]  ;;  %v188_v3 = vld [vmem:[%s3341_s0 + $0x18] sm:$0xff] }
   0x2   :  { %371 = vperm.xlu1 %1584, %v187_v1   ;;  %361 = vperm.xlu0 %1583, %v185_v2   ;;  %v186_v4 = vld [vmem:[%s3341_s0 + $0x8] sm:$0xff]  ;;  %v189_v6 = vld [vmem:[%s3341_s0 + $0x20] sm:$0xff]  ;;  %v192_v7 = vld [vmem:[%s3341_s0 + $0x38] sm:$0xff] }
   0x3   :  { %v190_v5 = vld [vmem:[%s3341_s0 + $0x28] sm:$0xff]  ;;  %v191_v8 = vld [vmem:[%s3341_s0 + $0x30] sm:$0xff]  ;;  %v193_v10 = vld [vmem:[%s3341_s0 + $0x40] sm:$0xff] }
   0x4   :  { %v194_v9 = vld [vmem:[%s3341_s0 + $0x48] sm:$0xff]  ;;  %v196_v11 = vld [vmem:[%s3341_s0 + $0x58] sm:$0xff]  ;;  %v195_v12 = vld [vmem:[%s3341_s0 + $0x50] sm:$0xff] }
   0x5   :  { %v198_v13 = vld [vmem:[%s3341_s0 + $0x68] sm:$0xff]  ;;  %v197_v14 = vld [vmem:[%s3341_s0 + $0x60] sm:$0xff]  ;;  %v200_v15 = vld [vmem:[%s3341_s0 + $0x78] sm:$0xff] }
   0x6   :  { %376 = vperm.xlu1 %1584, %v188_v3   ;;  %366 = vperm.xlu0 %1583, %v186_v4   ;;  %v199_v16 = vld [vmem:[%s3341_s0 + $0x70] sm:$0xff]  ;;  %v202_v17 = vld [vmem:[%s3341_s0 + $0x88] sm:$0xff]  ;;  %v201_v18 = vld [vmem:[%s3341_s0 + $0x80] sm:$0xff] }
   0x7   :  { %v204_v19 = vld [vmem:[%s3341_s0 + $0x98] sm:$0xff]  ;;  %v203_v20 = vld [vmem:[%s3341_s0 + $0x90] sm:$0xff]  ;;  %v206_v21 = vld [vmem:[%s3341_s0 + $0xa8] sm:$0xff] }
   0x8   :  { %v205_v22 = vld [vmem:[%s3341_s0 + $0xa0] sm:$0xff]  ;;  %v208_v23 = vld [vmem:[%s3341_s0 + $0xb8] sm:$0xff]  ;;  %v207_v24 = vld [vmem:[%s3341_s0 + $0xb0] sm:$0xff] }
   0x9   :  { %v210_v25 = vld [vmem:[%s3341_s0 + $0xc8] sm:$0xff]  ;;  %v209_v26 = vld [vmem:[%s3341_s0 + $0xc0] sm:$0xff]  ;;  %v212_v27 = vld [vmem:[%s3341_s0 + $0xd8] sm:$0xff] }
   0xa   :  { %386 = vperm.xlu1 %1584, %v190_v5   ;;  %381 = vperm.xlu0 %1583, %v189_v6   ;;  %v211_v28 = vld [vmem:[%s3341_s0 + $0xd0] sm:$0xff]  ;;  %v214_v29 = vld [vmem:[%s3341_s0 + $0xe8] sm:$0xff]  ;;  %v213_v30 = vld [vmem:[%s3341_s0 + $0xe0] sm:$0xff] }
   0xb   :  { %v216_v31 = vld [vmem:[%s3341_s0 + $0xf8] sm:$0xff]  ;;  %v215_v32 = vld [vmem:[%s3341_s0 + $0xf0] sm:$0xff]  ;;  %v218_v33 = vld [vmem:[%s3341_s0 + $0x108] sm:$0xff] }
   0xc   :  { %v217_v34 = vld [vmem:[%s3341_s0 + $0x100] sm:$0xff]  ;;  %v220_v35 = vld [vmem:[%s3341_s0 + $0x118] sm:$0xff]  ;;  %v219_v36 = vld [vmem:[%s3341_s0 + $0x110] sm:$0xff] }
   0xd   :  { %v222_v37 = vld [vmem:[%s3341_s0 + $0x128] sm:$0xff]  ;;  %v221_v38 = vld [vmem:[%s3341_s0 + $0x120] sm:$0xff]  ;;  %v224_v39 = vld [vmem:[%s3341_s0 + $0x138] sm:$0xff] }
   0xe   :  { %396 = vperm.xlu1 %1584, %v192_v7   ;;  %391 = vperm.xlu0 %1583, %v191_v8   ;;  %v223_v40 = vld [vmem:[%s3341_s0 + $0x130] sm:$0xff]  ;;  %v226_v41 = vld [vmem:[%s3341_s0 + $0x148] sm:$0xff]  ;;  %v225_v42 = vld [vmem:[%s3341_s0 + $0x140] sm:$0xff] }
   0xf   :  { %v228_v43 = vld [vmem:[%s3341_s0 + $0x158] sm:$0xff]  ;;  %v227_v44 = vld [vmem:[%s3341_s0 + $0x150] sm:$0xff]  ;;  %v230_v45 = vld [vmem:[%s3341_s0 + $0x168] sm:$0xff] }
  0x10   :  { %v229_v46 = vld [vmem:[%s3341_s0 + $0x160] sm:$0xff]  ;;  %v232_v47 = vld [vmem:[%s3341_s0 + $0x178] sm:$0xff]  ;;  %v231_v48 = vld [vmem:[%s3341_s0 + $0x170] sm:$0xff] }
  0x11   :  { %v234_v49 = vld [vmem:[%s3341_s0 + $0x188] sm:$0xff]  ;;  %v233_v50 = vld [vmem:[%s3341_s0 + $0x180] sm:$0xff]  ;;  %v236_v51 = vld [vmem:[%s3341_s0 + $0x198] sm:$0xff] }
  0x12   :  { %406 = vperm.xlu1 %1584, %v194_v9   ;;  %401 = vperm.xlu0 %1583, %v193_v10   ;;  %v235_v52 = vld [vmem:[%s3341_s0 + $0x190] sm:$0xff]  ;;  %v238_v53 = vld [vmem:[%s3341_s0 + $0x1a8] sm:$0xff]  ;;  %v237_v54 = vld [vmem:[%s3341_s0 + $0x1a0] sm:$0xff] }
  0x13   :  { %v240_v55 = vld [vmem:[%s3341_s0 + $0x1b8] sm:$0xff]  ;;  %v239_v56 = vld [vmem:[%s3341_s0 + $0x1b0] sm:$0xff]  ;;  %v242_v57 = vld [vmem:[%s3341_s0 + $0x1c8] sm:$0xff] }
  0x14   :  { %v241_v58 = vld [vmem:[%s3341_s0 + $0x1c0] sm:$0xff]  ;;  %v244_v59 = vld [vmem:[%s3341_s0 + $0x1d8] sm:$0xff]  ;;  %v243_v60 = vld [vmem:[%s3341_s0 + $0x1d0] sm:$0xff] }
  0x15   :  { %v246_v61 = vld [vmem:[%s3341_s0 + $0x1e8] sm:$0xff]  ;;  %v245_v62 = vld [vmem:[%s3341_s0 + $0x1e0] sm:$0xff]  ;;  %v248_v63 = vld [vmem:[%s3341_s0 + $0x1f8] sm:$0xff] }
  0x16   :  { %416 = vperm.xlu1 %1584, %v196_v11   ;;  %411 = vperm.xlu0 %1583, %v195_v12   ;;  %v247_v0 = vld [vmem:[%s3341_s0 + $0x1f0] sm:$0xff]  ;;  %v11_v2 = vld [vmem:[%s3342_s1] sm:$0xff]  ;;  %v250_v3 = vld [vmem:[%s3341_s0 + $0x208] sm:$0xff] }
  0x17   :  { %v13_v1 = vld [vmem:[%s3342_s1 + $0x10] sm:$0xff]  ;;  %v249_v4 = vld [vmem:[%s3341_s0 + $0x200] sm:$0xff]  ;;  %v14_v9 = vld [vmem:[%s3342_s1 + $0x18] sm:$0xff] }
  0x18   :  { %v12_v10 = vld [vmem:[%s3342_s1 + $0x8] sm:$0xff]  ;;  %v252_v11 = vld [vmem:[%s3341_s0 + $0x218] sm:$0xff]  ;;  %v251_v12 = vld [vmem:[%s3341_s0 + $0x210] sm:$0xff] }
  0x1a   :  { %426 = vperm.xlu1 %1584, %v198_v13   ;;  %421 = vperm.xlu0 %1583, %v197_v14  }
  0x1e   :  { %436 = vperm.xlu1 %1584, %v200_v15   ;;  %431 = vperm.xlu0 %1583, %v199_v16  }
  0x22   :  { %446 = vperm.xlu1 %1584, %v202_v17   ;;  %441 = vperm.xlu0 %1583, %v201_v18   ;;  %v16_v17 = vld [vmem:[%s3342_s1 + $0x28] sm:$0xff]  ;;  %v15_v18 = vld [vmem:[%s3342_s1 + $0x20] sm:$0xff] }
  0x26   :  { %456 = vperm.xlu1 %1584, %v204_v19   ;;  %451 = vperm.xlu0 %1583, %v203_v20   ;;  %v254_v19 = vld [vmem:[%s3341_s0 + $0x228] sm:$0xff]  ;;  %v253_v20 = vld [vmem:[%s3341_s0 + $0x220] sm:$0xff] }
  0x2a   :  { %466 = vperm.xlu1 %1584, %v206_v21   ;;  %461 = vperm.xlu0 %1583, %v205_v22  }
  0x2e   :  { %476 = vperm.xlu1 %1584, %v208_v23   ;;  %471 = vperm.xlu0 %1583, %v207_v24  }
  0x32   :  { %486 = vperm.xlu1 %1584, %v210_v25   ;;  %481 = vperm.xlu0 %1583, %v209_v26   ;;  %v18_v25 = vld [vmem:[%s3342_s1 + $0x38] sm:$0xff]  ;;  %v17_v26 = vld [vmem:[%s3342_s1 + $0x30] sm:$0xff] }
  0x36   :  { %496 = vperm.xlu1 %1584, %v212_v27   ;;  %491 = vperm.xlu0 %1583, %v211_v28   ;;  %v256_v27 = vld [vmem:[%s3341_s0 + $0x238] sm:$0xff]  ;;  %v255_v28 = vld [vmem:[%s3341_s0 + $0x230] sm:$0xff] }
  0x3a   :  { %506 = vperm.xlu1 %1584, %v214_v29   ;;  %501 = vperm.xlu0 %1583, %v213_v30  }
  0x3e   :  { %516 = vperm.xlu1 %1584, %v216_v31   ;;  %511 = vperm.xlu0 %1583, %v215_v32  }
  0x42   :  { %526 = vperm.xlu1 %1584, %v218_v33   ;;  %521 = vperm.xlu0 %1583, %v217_v34   ;;  %v20_v33 = vld [vmem:[%s3342_s1 + $0x48] sm:$0xff]  ;;  %v19_v34 = vld [vmem:[%s3342_s1 + $0x40] sm:$0xff] }
  0x46   :  { %536 = vperm.xlu1 %1584, %v220_v35   ;;  %531 = vperm.xlu0 %1583, %v219_v36   ;;  %v258_v35 = vld [vmem:[%s3341_s0 + $0x248] sm:$0xff]  ;;  %v257_v36 = vld [vmem:[%s3341_s0 + $0x240] sm:$0xff] }
  0x4a   :  { %546 = vperm.xlu1 %1584, %v222_v37   ;;  %541 = vperm.xlu0 %1583, %v221_v38  }
  0x4e   :  { %556 = vperm.xlu1 %1584, %v224_v39   ;;  %551 = vperm.xlu0 %1583, %v223_v40  }
  0x52   :  { %566 = vperm.xlu1 %1584, %v226_v41   ;;  %561 = vperm.xlu0 %1583, %v225_v42   ;;  %v22_v41 = vld [vmem:[%s3342_s1 + $0x58] sm:$0xff]  ;;  %v21_v42 = vld [vmem:[%s3342_s1 + $0x50] sm:$0xff] }
  0x56   :  { %576 = vperm.xlu1 %1584, %v228_v43   ;;  %571 = vperm.xlu0 %1583, %v227_v44   ;;  %v260_v43 = vld [vmem:[%s3341_s0 + $0x258] sm:$0xff]  ;;  %v259_v44 = vld [vmem:[%s3341_s0 + $0x250] sm:$0xff] }
  0x5a   :  { %586 = vperm.xlu1 %1584, %v230_v45   ;;  %581 = vperm.xlu0 %1583, %v229_v46  }
  0x5e   :  { %596 = vperm.xlu1 %1584, %v232_v47   ;;  %591 = vperm.xlu0 %1583, %v231_v48  }
  0x62   :  { %606 = vperm.xlu1 %1584, %v234_v49   ;;  %601 = vperm.xlu0 %1583, %v233_v50   ;;  %v24_v49 = vld [vmem:[%s3342_s1 + $0x68] sm:$0xff]  ;;  %v23_v50 = vld [vmem:[%s3342_s1 + $0x60] sm:$0xff] }
  0x66   :  { %616 = vperm.xlu1 %1584, %v236_v51   ;;  %611 = vperm.xlu0 %1583, %v235_v52   ;;  %v262_v51 = vld [vmem:[%s3341_s0 + $0x268] sm:$0xff]  ;;  %v261_v52 = vld [vmem:[%s3341_s0 + $0x260] sm:$0xff] }
  0x6a   :  { %626 = vperm.xlu1 %1584, %v238_v53   ;;  %621 = vperm.xlu0 %1583, %v237_v54  }
  0x6e   :  { %636 = vperm.xlu1 %1584, %v240_v55   ;;  %631 = vperm.xlu0 %1583, %v239_v56  }
  0x72   :  { %646 = vperm.xlu1 %1584, %v242_v57   ;;  %641 = vperm.xlu0 %1583, %v241_v58   ;;  %v26_v57 = vld [vmem:[%s3342_s1 + $0x78] sm:$0xff]  ;;  %v25_v58 = vld [vmem:[%s3342_s1 + $0x70] sm:$0xff] }
  0x76   :  { %656 = vperm.xlu1 %1584, %v244_v59   ;;  %651 = vperm.xlu0 %1583, %v243_v60   ;;  %v264_v59 = vld [vmem:[%s3341_s0 + $0x278] sm:$0xff]  ;;  %v263_v60 = vld [vmem:[%s3341_s0 + $0x270] sm:$0xff] }
  0x7a   :  { %666 = vperm.xlu1 %1584, %v246_v61   ;;  %661 = vperm.xlu0 %1583, %v245_v62  }
  0x7e   :  { %676 = vperm.xlu1 %1584, %v248_v63   ;;  %671 = vperm.xlu0 %1583, %v247_v0  }
  0x81   :  { %v372_v5 = vpop.permute.xlu1 %371  ;;  %v362_v6 = vpop.permute.xlu0 %361 }
  0x82   :  { %v1231_v7 = vmul.f32 %v372_v5, %v13_v1  ;;  %v1229_v8 = vmul.f32 %v362_v6, %v11_v2  ;;  %686 = vperm.xlu1 %1584, %v250_v3   ;;  %681 = vperm.xlu0 %1583, %v249_v4   ;;  %v28_v1 = vld [vmem:[%s3342_s1 + $0x88] sm:$0xff]  ;;  %v27_v2 = vld [vmem:[%s3342_s1 + $0x80] sm:$0xff] }
  0x83   :  { %v266_v3 = vld [vmem:[%s3341_s0 + $0x288] sm:$0xff]  ;;  %v265_v4 = vld [vmem:[%s3341_s0 + $0x280] sm:$0xff] }
  0x84   :  { %1406 = vst.msk [vmem:[%s3343_s2 + $0x10] sm:$0xff] %vm1403_vm0, %v1231_v7  ;;  %1404 = vst.msk [vmem:[%s3343_s2] sm:$0xff] %vm1403_vm0, %v1229_v8 }
  0x85   :  { %v377_v13 = vpop.permute.xlu1 %376  ;;  %v367_v14 = vpop.permute.xlu0 %366 }
  0x86   :  { %v1232_v15 = vmul.f32 %v377_v13, %v14_v9  ;;  %v1230_v16 = vmul.f32 %v367_v14, %v12_v10  ;;  %696 = vperm.xlu1 %1584, %v252_v11   ;;  %691 = vperm.xlu0 %1583, %v251_v12   ;;  %v30_v9 = vld [vmem:[%s3342_s1 + $0x98] sm:$0xff]  ;;  %v29_v10 = vld [vmem:[%s3342_s1 + $0x90] sm:$0xff] }
  0x87   :  { %v268_v11 = vld [vmem:[%s3341_s0 + $0x298] sm:$0xff]  ;;  %v267_v12 = vld [vmem:[%s3341_s0 + $0x290] sm:$0xff] }
  0x88   :  { %1407 = vst.msk [vmem:[%s3343_s2 + $0x18] sm:$0xff] %vm1403_vm0, %v1232_v15  ;;  %1405 = vst.msk [vmem:[%s3343_s2 + $0x8] sm:$0xff] %vm1403_vm0, %v1230_v16 }
  0x89   :  { %v387_v21 = vpop.permute.xlu1 %386  ;;  %v382_v22 = vpop.permute.xlu0 %381 }
  0x8a   :  { %v1234_v23 = vmul.f32 %v387_v21, %v16_v17  ;;  %v1233_v24 = vmul.f32 %v382_v22, %v15_v18  ;;  %706 = vperm.xlu1 %1584, %v254_v19   ;;  %701 = vperm.xlu0 %1583, %v253_v20   ;;  %v32_v17 = vld [vmem:[%s3342_s1 + $0xa8] sm:$0xff]  ;;  %v31_v18 = vld [vmem:[%s3342_s1 + $0xa0] sm:$0xff] }
  0x8b   :  { %v270_v19 = vld [vmem:[%s3341_s0 + $0x2a8] sm:$0xff]  ;;  %v269_v20 = vld [vmem:[%s3341_s0 + $0x2a0] sm:$0xff] }
  0x8c   :  { %1409 = vst.msk [vmem:[%s3343_s2 + $0x28] sm:$0xff] %vm1403_vm0, %v1234_v23  ;;  %1408 = vst.msk [vmem:[%s3343_s2 + $0x20] sm:$0xff] %vm1403_vm0, %v1233_v24 }
  0x8d   :  { %v397_v29 = vpop.permute.xlu1 %396  ;;  %v392_v30 = vpop.permute.xlu0 %391 }
  0x8e   :  { %v1236_v31 = vmul.f32 %v397_v29, %v18_v25  ;;  %v1235_v32 = vmul.f32 %v392_v30, %v17_v26  ;;  %716 = vperm.xlu1 %1584, %v256_v27   ;;  %711 = vperm.xlu0 %1583, %v255_v28   ;;  %v34_v25 = vld [vmem:[%s3342_s1 + $0xb8] sm:$0xff]  ;;  %v33_v26 = vld [vmem:[%s3342_s1 + $0xb0] sm:$0xff] }
  0x8f   :  { %v272_v27 = vld [vmem:[%s3341_s0 + $0x2b8] sm:$0xff]  ;;  %v271_v28 = vld [vmem:[%s3341_s0 + $0x2b0] sm:$0xff] }
  0x90   :  { %1411 = vst.msk [vmem:[%s3343_s2 + $0x38] sm:$0xff] %vm1403_vm0, %v1236_v31  ;;  %1410 = vst.msk [vmem:[%s3343_s2 + $0x30] sm:$0xff] %vm1403_vm0, %v1235_v32 }
  0x91   :  { %v407_v37 = vpop.permute.xlu1 %406  ;;  %v402_v38 = vpop.permute.xlu0 %401 }
  0x92   :  { %v1238_v39 = vmul.f32 %v407_v37, %v20_v33  ;;  %v1237_v40 = vmul.f32 %v402_v38, %v19_v34  ;;  %726 = vperm.xlu1 %1584, %v258_v35   ;;  %721 = vperm.xlu0 %1583, %v257_v36   ;;  %v36_v33 = vld [vmem:[%s3342_s1 + $0xc8] sm:$0xff]  ;;  %v35_v34 = vld [vmem:[%s3342_s1 + $0xc0] sm:$0xff] }
  0x93   :  { %v274_v35 = vld [vmem:[%s3341_s0 + $0x2c8] sm:$0xff]  ;;  %v273_v36 = vld [vmem:[%s3341_s0 + $0x2c0] sm:$0xff] }
  0x94   :  { %1413 = vst.msk [vmem:[%s3343_s2 + $0x48] sm:$0xff] %vm1403_vm0, %v1238_v39  ;;  %1412 = vst.msk [vmem:[%s3343_s2 + $0x40] sm:$0xff] %vm1403_vm0, %v1237_v40 }
  0x95   :  { %v417_v45 = vpop.permute.xlu1 %416  ;;  %v412_v46 = vpop.permute.xlu0 %411 }
  0x96   :  { %v1240_v47 = vmul.f32 %v417_v45, %v22_v41  ;;  %v1239_v48 = vmul.f32 %v412_v46, %v21_v42  ;;  %736 = vperm.xlu1 %1584, %v260_v43   ;;  %731 = vperm.xlu0 %1583, %v259_v44   ;;  %v38_v41 = vld [vmem:[%s3342_s1 + $0xd8] sm:$0xff]  ;;  %v37_v42 = vld [vmem:[%s3342_s1 + $0xd0] sm:$0xff] }
  0x97   :  { %v276_v43 = vld [vmem:[%s3341_s0 + $0x2d8] sm:$0xff]  ;;  %v275_v44 = vld [vmem:[%s3341_s0 + $0x2d0] sm:$0xff] }
  0x98   :  { %1415 = vst.msk [vmem:[%s3343_s2 + $0x58] sm:$0xff] %vm1403_vm0, %v1240_v47  ;;  %1414 = vst.msk [vmem:[%s3343_s2 + $0x50] sm:$0xff] %vm1403_vm0, %v1239_v48 }
  0x99   :  { %v427_v53 = vpop.permute.xlu1 %426  ;;  %v422_v54 = vpop.permute.xlu0 %421 }
  0x9a   :  { %v1242_v55 = vmul.f32 %v427_v53, %v24_v49  ;;  %v1241_v56 = vmul.f32 %v422_v54, %v23_v50  ;;  %746 = vperm.xlu1 %1584, %v262_v51   ;;  %741 = vperm.xlu0 %1583, %v261_v52   ;;  %v40_v49 = vld [vmem:[%s3342_s1 + $0xe8] sm:$0xff]  ;;  %v39_v50 = vld [vmem:[%s3342_s1 + $0xe0] sm:$0xff] }
  0x9b   :  { %v278_v51 = vld [vmem:[%s3341_s0 + $0x2e8] sm:$0xff]  ;;  %v277_v52 = vld [vmem:[%s3341_s0 + $0x2e0] sm:$0xff] }
  0x9c   :  { %1417 = vst.msk [vmem:[%s3343_s2 + $0x68] sm:$0xff] %vm1403_vm0, %v1242_v55  ;;  %1416 = vst.msk [vmem:[%s3343_s2 + $0x60] sm:$0xff] %vm1403_vm0, %v1241_v56 }
  0x9d   :  { %v437_v61 = vpop.permute.xlu1 %436  ;;  %v432_v62 = vpop.permute.xlu0 %431 }
  0x9e   :  { %v1244_v63 = vmul.f32 %v437_v61, %v26_v57  ;;  %v1243_v0 = vmul.f32 %v432_v62, %v25_v58  ;;  %756 = vperm.xlu1 %1584, %v264_v59   ;;  %751 = vperm.xlu0 %1583, %v263_v60   ;;  %v42_v57 = vld [vmem:[%s3342_s1 + $0xf8] sm:$0xff]  ;;  %v41_v58 = vld [vmem:[%s3342_s1 + $0xf0] sm:$0xff] }
  0x9f   :  { %v280_v59 = vld [vmem:[%s3341_s0 + $0x2f8] sm:$0xff]  ;;  %v279_v60 = vld [vmem:[%s3341_s0 + $0x2f0] sm:$0xff] }
  0xa0   :  { %1419 = vst.msk [vmem:[%s3343_s2 + $0x78] sm:$0xff] %vm1403_vm0, %v1244_v63  ;;  %1418 = vst.msk [vmem:[%s3343_s2 + $0x70] sm:$0xff] %vm1403_vm0, %v1243_v0 }
  0xa1   :  { %v447_v5 = vpop.permute.xlu1 %446  ;;  %v442_v6 = vpop.permute.xlu0 %441 }
  0xa2   :  { %v1246_v7 = vmul.f32 %v447_v5, %v28_v1  ;;  %v1245_v8 = vmul.f32 %v442_v6, %v27_v2  ;;  %766 = vperm.xlu1 %1584, %v266_v3   ;;  %761 = vperm.xlu0 %1583, %v265_v4   ;;  %v44_v1 = vld [vmem:[%s3342_s1 + $0x108] sm:$0xff]  ;;  %v43_v2 = vld [vmem:[%s3342_s1 + $0x100] sm:$0xff] }
  0xa3   :  { %v282_v3 = vld [vmem:[%s3341_s0 + $0x308] sm:$0xff]  ;;  %v281_v4 = vld [vmem:[%s3341_s0 + $0x300] sm:$0xff] }
  0xa4   :  { %1421 = vst.msk [vmem:[%s3343_s2 + $0x88] sm:$0xff] %vm1403_vm0, %v1246_v7  ;;  %1420 = vst.msk [vmem:[%s3343_s2 + $0x80] sm:$0xff] %vm1403_vm0, %v1245_v8 }
  0xa5   :  { %v457_v13 = vpop.permute.xlu1 %456  ;;  %v452_v14 = vpop.permute.xlu0 %451 }
  0xa6   :  { %v1248_v15 = vmul.f32 %v457_v13, %v30_v9  ;;  %v1247_v16 = vmul.f32 %v452_v14, %v29_v10  ;;  %776 = vperm.xlu1 %1584, %v268_v11   ;;  %771 = vperm.xlu0 %1583, %v267_v12   ;;  %v46_v9 = vld [vmem:[%s3342_s1 + $0x118] sm:$0xff]  ;;  %v45_v10 = vld [vmem:[%s3342_s1 + $0x110] sm:$0xff] }
  0xa7   :  { %v284_v11 = vld [vmem:[%s3341_s0 + $0x318] sm:$0xff]  ;;  %v283_v12 = vld [vmem:[%s3341_s0 + $0x310] sm:$0xff] }
  0xa8   :  { %1423 = vst.msk [vmem:[%s3343_s2 + $0x98] sm:$0xff] %vm1403_vm0, %v1248_v15  ;;  %1422 = vst.msk [vmem:[%s3343_s2 + $0x90] sm:$0xff] %vm1403_vm0, %v1247_v16 }
  0xa9   :  { %v467_v21 = vpop.permute.xlu1 %466  ;;  %v462_v22 = vpop.permute.xlu0 %461 }
  0xaa   :  { %v1250_v23 = vmul.f32 %v467_v21, %v32_v17  ;;  %v1249_v24 = vmul.f32 %v462_v22, %v31_v18  ;;  %786 = vperm.xlu1 %1584, %v270_v19   ;;  %781 = vperm.xlu0 %1583, %v269_v20   ;;  %v48_v17 = vld [vmem:[%s3342_s1 + $0x128] sm:$0xff]  ;;  %v47_v18 = vld [vmem:[%s3342_s1 + $0x120] sm:$0xff] }
  0xab   :  { %v286_v19 = vld [vmem:[%s3341_s0 + $0x328] sm:$0xff]  ;;  %v285_v20 = vld [vmem:[%s3341_s0 + $0x320] sm:$0xff] }
  0xac   :  { %1425 = vst.msk [vmem:[%s3343_s2 + $0xa8] sm:$0xff] %vm1403_vm0, %v1250_v23  ;;  %1424 = vst.msk [vmem:[%s3343_s2 + $0xa0] sm:$0xff] %vm1403_vm0, %v1249_v24 }
  0xad   :  { %v477_v29 = vpop.permute.xlu1 %476  ;;  %v472_v30 = vpop.permute.xlu0 %471 }
  0xae   :  { %v1252_v31 = vmul.f32 %v477_v29, %v34_v25  ;;  %v1251_v32 = vmul.f32 %v472_v30, %v33_v26  ;;  %796 = vperm.xlu1 %1584, %v272_v27   ;;  %791 = vperm.xlu0 %1583, %v271_v28   ;;  %v50_v25 = vld [vmem:[%s3342_s1 + $0x138] sm:$0xff]  ;;  %v49_v26 = vld [vmem:[%s3342_s1 + $0x130] sm:$0xff] }
  0xaf   :  { %v288_v27 = vld [vmem:[%s3341_s0 + $0x338] sm:$0xff]  ;;  %v287_v28 = vld [vmem:[%s3341_s0 + $0x330] sm:$0xff] }
  0xb0   :  { %1427 = vst.msk [vmem:[%s3343_s2 + $0xb8] sm:$0xff] %vm1403_vm0, %v1252_v31  ;;  %1426 = vst.msk [vmem:[%s3343_s2 + $0xb0] sm:$0xff] %vm1403_vm0, %v1251_v32 }
  0xb1   :  { %v487_v37 = vpop.permute.xlu1 %486  ;;  %v482_v38 = vpop.permute.xlu0 %481 }
  0xb2   :  { %v1254_v39 = vmul.f32 %v487_v37, %v36_v33  ;;  %v1253_v40 = vmul.f32 %v482_v38, %v35_v34  ;;  %806 = vperm.xlu1 %1584, %v274_v35   ;;  %801 = vperm.xlu0 %1583, %v273_v36   ;;  %v52_v33 = vld [vmem:[%s3342_s1 + $0x148] sm:$0xff]  ;;  %v51_v34 = vld [vmem:[%s3342_s1 + $0x140] sm:$0xff] }
  0xb3   :  { %v290_v35 = vld [vmem:[%s3341_s0 + $0x348] sm:$0xff]  ;;  %v289_v36 = vld [vmem:[%s3341_s0 + $0x340] sm:$0xff] }
  0xb4   :  { %1429 = vst.msk [vmem:[%s3343_s2 + $0xc8] sm:$0xff] %vm1403_vm0, %v1254_v39  ;;  %1428 = vst.msk [vmem:[%s3343_s2 + $0xc0] sm:$0xff] %vm1403_vm0, %v1253_v40 }
  0xb5   :  { %v497_v45 = vpop.permute.xlu1 %496  ;;  %v492_v46 = vpop.permute.xlu0 %491 }
  0xb6   :  { %v1256_v47 = vmul.f32 %v497_v45, %v38_v41  ;;  %v1255_v48 = vmul.f32 %v492_v46, %v37_v42  ;;  %816 = vperm.xlu1 %1584, %v276_v43   ;;  %811 = vperm.xlu0 %1583, %v275_v44   ;;  %v54_v41 = vld [vmem:[%s3342_s1 + $0x158] sm:$0xff]  ;;  %v53_v42 = vld [vmem:[%s3342_s1 + $0x150] sm:$0xff] }
  0xb7   :  { %v292_v43 = vld [vmem:[%s3341_s0 + $0x358] sm:$0xff]  ;;  %v291_v44 = vld [vmem:[%s3341_s0 + $0x350] sm:$0xff] }
  0xb8   :  { %1431 = vst.msk [vmem:[%s3343_s2 + $0xd8] sm:$0xff] %vm1403_vm0, %v1256_v47  ;;  %1430 = vst.msk [vmem:[%s3343_s2 + $0xd0] sm:$0xff] %vm1403_vm0, %v1255_v48 }
  0xb9   :  { %v507_v53 = vpop.permute.xlu1 %506  ;;  %v502_v54 = vpop.permute.xlu0 %501 }
  0xba   :  { %v1258_v55 = vmul.f32 %v507_v53, %v40_v49  ;;  %v1257_v56 = vmul.f32 %v502_v54, %v39_v50  ;;  %826 = vperm.xlu1 %1584, %v278_v51   ;;  %821 = vperm.xlu0 %1583, %v277_v52   ;;  %v56_v49 = vld [vmem:[%s3342_s1 + $0x168] sm:$0xff]  ;;  %v55_v50 = vld [vmem:[%s3342_s1 + $0x160] sm:$0xff] }
  0xbb   :  { %v294_v51 = vld [vmem:[%s3341_s0 + $0x368] sm:$0xff]  ;;  %v293_v52 = vld [vmem:[%s3341_s0 + $0x360] sm:$0xff] }
  0xbc   :  { %1433 = vst.msk [vmem:[%s3343_s2 + $0xe8] sm:$0xff] %vm1403_vm0, %v1258_v55  ;;  %1432 = vst.msk [vmem:[%s3343_s2 + $0xe0] sm:$0xff] %vm1403_vm0, %v1257_v56 }
  0xbd   :  { %v517_v61 = vpop.permute.xlu1 %516  ;;  %v512_v62 = vpop.permute.xlu0 %511 }
  0xbe   :  { %v1260_v63 = vmul.f32 %v517_v61, %v42_v57  ;;  %v1259_v0 = vmul.f32 %v512_v62, %v41_v58  ;;  %836 = vperm.xlu1 %1584, %v280_v59   ;;  %831 = vperm.xlu0 %1583, %v279_v60   ;;  %v58_v57 = vld [vmem:[%s3342_s1 + $0x178] sm:$0xff]  ;;  %v57_v58 = vld [vmem:[%s3342_s1 + $0x170] sm:$0xff] }
  0xbf   :  { %v296_v59 = vld [vmem:[%s3341_s0 + $0x378] sm:$0xff]  ;;  %v295_v60 = vld [vmem:[%s3341_s0 + $0x370] sm:$0xff] }
  0xc0   :  { %1435 = vst.msk [vmem:[%s3343_s2 + $0xf8] sm:$0xff] %vm1403_vm0, %v1260_v63  ;;  %1434 = vst.msk [vmem:[%s3343_s2 + $0xf0] sm:$0xff] %vm1403_vm0, %v1259_v0 }
  0xc1   :  { %v527_v5 = vpop.permute.xlu1 %526  ;;  %v522_v6 = vpop.permute.xlu0 %521 }
  0xc2   :  { %v1262_v7 = vmul.f32 %v527_v5, %v44_v1  ;;  %v1261_v8 = vmul.f32 %v522_v6, %v43_v2  ;;  %846 = vperm.xlu1 %1584, %v282_v3   ;;  %841 = vperm.xlu0 %1583, %v281_v4   ;;  %v60_v1 = vld [vmem:[%s3342_s1 + $0x188] sm:$0xff]  ;;  %v59_v2 = vld [vmem:[%s3342_s1 + $0x180] sm:$0xff] }
  0xc3   :  { %v298_v3 = vld [vmem:[%s3341_s0 + $0x388] sm:$0xff]  ;;  %v297_v4 = vld [vmem:[%s3341_s0 + $0x380] sm:$0xff] }
  0xc4   :  { %1437 = vst.msk [vmem:[%s3343_s2 + $0x108] sm:$0xff] %vm1403_vm0, %v1262_v7  ;;  %1436 = vst.msk [vmem:[%s3343_s2 + $0x100] sm:$0xff] %vm1403_vm0, %v1261_v8 }
  0xc5   :  { %v537_v13 = vpop.permute.xlu1 %536  ;;  %v532_v14 = vpop.permute.xlu0 %531 }
  0xc6   :  { %v1264_v15 = vmul.f32 %v537_v13, %v46_v9  ;;  %v1263_v16 = vmul.f32 %v532_v14, %v45_v10  ;;  %856 = vperm.xlu1 %1584, %v284_v11   ;;  %851 = vperm.xlu0 %1583, %v283_v12   ;;  %v62_v9 = vld [vmem:[%s3342_s1 + $0x198] sm:$0xff]  ;;  %v61_v10 = vld [vmem:[%s3342_s1 + $0x190] sm:$0xff] }
  0xc7   :  { %v300_v11 = vld [vmem:[%s3341_s0 + $0x398] sm:$0xff]  ;;  %v299_v12 = vld [vmem:[%s3341_s0 + $0x390] sm:$0xff] }
  0xc8   :  { %1439 = vst.msk [vmem:[%s3343_s2 + $0x118] sm:$0xff] %vm1403_vm0, %v1264_v15  ;;  %1438 = vst.msk [vmem:[%s3343_s2 + $0x110] sm:$0xff] %vm1403_vm0, %v1263_v16 }
  0xc9   :  { %v547_v21 = vpop.permute.xlu1 %546  ;;  %v542_v22 = vpop.permute.xlu0 %541 }
  0xca   :  { %v1266_v23 = vmul.f32 %v547_v21, %v48_v17  ;;  %v1265_v24 = vmul.f32 %v542_v22, %v47_v18  ;;  %866 = vperm.xlu1 %1584, %v286_v19   ;;  %861 = vperm.xlu0 %1583, %v285_v20   ;;  %v64_v17 = vld [vmem:[%s3342_s1 + $0x1a8] sm:$0xff]  ;;  %v63_v18 = vld [vmem:[%s3342_s1 + $0x1a0] sm:$0xff] }
  0xcb   :  { %v302_v19 = vld [vmem:[%s3341_s0 + $0x3a8] sm:$0xff]  ;;  %v301_v20 = vld [vmem:[%s3341_s0 + $0x3a0] sm:$0xff] }
  0xcc   :  { %1441 = vst.msk [vmem:[%s3343_s2 + $0x128] sm:$0xff] %vm1403_vm0, %v1266_v23  ;;  %1440 = vst.msk [vmem:[%s3343_s2 + $0x120] sm:$0xff] %vm1403_vm0, %v1265_v24 }
  0xcd   :  { %v557_v29 = vpop.permute.xlu1 %556  ;;  %v552_v30 = vpop.permute.xlu0 %551 }
  0xce   :  { %v1268_v31 = vmul.f32 %v557_v29, %v50_v25  ;;  %v1267_v32 = vmul.f32 %v552_v30, %v49_v26  ;;  %876 = vperm.xlu1 %1584, %v288_v27   ;;  %871 = vperm.xlu0 %1583, %v287_v28   ;;  %v66_v25 = vld [vmem:[%s3342_s1 + $0x1b8] sm:$0xff]  ;;  %v65_v26 = vld [vmem:[%s3342_s1 + $0x1b0] sm:$0xff] }
  0xcf   :  { %v304_v27 = vld [vmem:[%s3341_s0 + $0x3b8] sm:$0xff]  ;;  %v303_v28 = vld [vmem:[%s3341_s0 + $0x3b0] sm:$0xff] }
  0xd0   :  { %1443 = vst.msk [vmem:[%s3343_s2 + $0x138] sm:$0xff] %vm1403_vm0, %v1268_v31  ;;  %1442 = vst.msk [vmem:[%s3343_s2 + $0x130] sm:$0xff] %vm1403_vm0, %v1267_v32 }
  0xd1   :  { %v567_v37 = vpop.permute.xlu1 %566  ;;  %v562_v38 = vpop.permute.xlu0 %561 }
  0xd2   :  { %v1270_v39 = vmul.f32 %v567_v37, %v52_v33  ;;  %v1269_v40 = vmul.f32 %v562_v38, %v51_v34  ;;  %886 = vperm.xlu1 %1584, %v290_v35   ;;  %881 = vperm.xlu0 %1583, %v289_v36   ;;  %v68_v33 = vld [vmem:[%s3342_s1 + $0x1c8] sm:$0xff]  ;;  %v67_v34 = vld [vmem:[%s3342_s1 + $0x1c0] sm:$0xff] }
  0xd3   :  { %v306_v35 = vld [vmem:[%s3341_s0 + $0x3c8] sm:$0xff]  ;;  %v305_v36 = vld [vmem:[%s3341_s0 + $0x3c0] sm:$0xff] }
  0xd4   :  { %1445 = vst.msk [vmem:[%s3343_s2 + $0x148] sm:$0xff] %vm1403_vm0, %v1270_v39  ;;  %1444 = vst.msk [vmem:[%s3343_s2 + $0x140] sm:$0xff] %vm1403_vm0, %v1269_v40 }
  0xd5   :  { %v577_v45 = vpop.permute.xlu1 %576  ;;  %v572_v46 = vpop.permute.xlu0 %571 }
  0xd6   :  { %v1272_v47 = vmul.f32 %v577_v45, %v54_v41  ;;  %v1271_v48 = vmul.f32 %v572_v46, %v53_v42  ;;  %896 = vperm.xlu1 %1584, %v292_v43   ;;  %891 = vperm.xlu0 %1583, %v291_v44   ;;  %v70_v41 = vld [vmem:[%s3342_s1 + $0x1d8] sm:$0xff]  ;;  %v69_v42 = vld [vmem:[%s3342_s1 + $0x1d0] sm:$0xff] }
  0xd7   :  { %v308_v43 = vld [vmem:[%s3341_s0 + $0x3d8] sm:$0xff]  ;;  %v307_v44 = vld [vmem:[%s3341_s0 + $0x3d0] sm:$0xff] }
  0xd8   :  { %1447 = vst.msk [vmem:[%s3343_s2 + $0x158] sm:$0xff] %vm1403_vm0, %v1272_v47  ;;  %1446 = vst.msk [vmem:[%s3343_s2 + $0x150] sm:$0xff] %vm1403_vm0, %v1271_v48 }
  0xd9   :  { %v587_v53 = vpop.permute.xlu1 %586  ;;  %v582_v54 = vpop.permute.xlu0 %581 }
  0xda   :  { %v1274_v55 = vmul.f32 %v587_v53, %v56_v49  ;;  %v1273_v56 = vmul.f32 %v582_v54, %v55_v50  ;;  %906 = vperm.xlu1 %1584, %v294_v51   ;;  %901 = vperm.xlu0 %1583, %v293_v52   ;;  %v72_v49 = vld [vmem:[%s3342_s1 + $0x1e8] sm:$0xff]  ;;  %v71_v50 = vld [vmem:[%s3342_s1 + $0x1e0] sm:$0xff] }
  0xdb   :  { %v310_v51 = vld [vmem:[%s3341_s0 + $0x3e8] sm:$0xff]  ;;  %v309_v52 = vld [vmem:[%s3341_s0 + $0x3e0] sm:$0xff] }
  0xdc   :  { %1449 = vst.msk [vmem:[%s3343_s2 + $0x168] sm:$0xff] %vm1403_vm0, %v1274_v55  ;;  %1448 = vst.msk [vmem:[%s3343_s2 + $0x160] sm:$0xff] %vm1403_vm0, %v1273_v56 }
  0xdd   :  { %v597_v61 = vpop.permute.xlu1 %596  ;;  %v592_v62 = vpop.permute.xlu0 %591 }
  0xde   :  { %v1276_v63 = vmul.f32 %v597_v61, %v58_v57  ;;  %v1275_v0 = vmul.f32 %v592_v62, %v57_v58  ;;  %916 = vperm.xlu1 %1584, %v296_v59   ;;  %911 = vperm.xlu0 %1583, %v295_v60   ;;  %v74_v57 = vld [vmem:[%s3342_s1 + $0x1f8] sm:$0xff]  ;;  %v73_v58 = vld [vmem:[%s3342_s1 + $0x1f0] sm:$0xff] }
  0xdf   :  { %v312_v59 = vld [vmem:[%s3341_s0 + $0x3f8] sm:$0xff]  ;;  %v311_v60 = vld [vmem:[%s3341_s0 + $0x3f0] sm:$0xff] }
  0xe0   :  { %1451 = vst.msk [vmem:[%s3343_s2 + $0x178] sm:$0xff] %vm1403_vm0, %v1276_v63  ;;  %1450 = vst.msk [vmem:[%s3343_s2 + $0x170] sm:$0xff] %vm1403_vm0, %v1275_v0 }
  0xe1   :  { %v607_v5 = vpop.permute.xlu1 %606  ;;  %v602_v6 = vpop.permute.xlu0 %601 }
  0xe2   :  { %v1278_v7 = vmul.f32 %v607_v5, %v60_v1  ;;  %v1277_v8 = vmul.f32 %v602_v6, %v59_v2  ;;  %926 = vperm.xlu1 %1584, %v298_v3   ;;  %921 = vperm.xlu0 %1583, %v297_v4   ;;  %v76_v1 = vld [vmem:[%s3342_s1 + $0x208] sm:$0xff]  ;;  %v75_v2 = vld [vmem:[%s3342_s1 + $0x200] sm:$0xff] }
  0xe3   :  { %v314_v3 = vld [vmem:[%s3341_s0 + $0x408] sm:$0xff]  ;;  %v313_v4 = vld [vmem:[%s3341_s0 + $0x400] sm:$0xff] }
  0xe4   :  { %1453 = vst.msk [vmem:[%s3343_s2 + $0x188] sm:$0xff] %vm1403_vm0, %v1278_v7  ;;  %1452 = vst.msk [vmem:[%s3343_s2 + $0x180] sm:$0xff] %vm1403_vm0, %v1277_v8 }
  0xe5   :  { %v617_v13 = vpop.permute.xlu1 %616  ;;  %v612_v14 = vpop.permute.xlu0 %611 }
  0xe6   :  { %v1280_v15 = vmul.f32 %v617_v13, %v62_v9  ;;  %v1279_v16 = vmul.f32 %v612_v14, %v61_v10  ;;  %936 = vperm.xlu1 %1584, %v300_v11   ;;  %931 = vperm.xlu0 %1583, %v299_v12   ;;  %v78_v9 = vld [vmem:[%s3342_s1 + $0x218] sm:$0xff]  ;;  %v77_v10 = vld [vmem:[%s3342_s1 + $0x210] sm:$0xff] }
  0xe7   :  { %v316_v11 = vld [vmem:[%s3341_s0 + $0x418] sm:$0xff]  ;;  %v315_v12 = vld [vmem:[%s3341_s0 + $0x410] sm:$0xff] }
  0xe8   :  { %1455 = vst.msk [vmem:[%s3343_s2 + $0x198] sm:$0xff] %vm1403_vm0, %v1280_v15  ;;  %1454 = vst.msk [vmem:[%s3343_s2 + $0x190] sm:$0xff] %vm1403_vm0, %v1279_v16 }
  0xe9   :  { %v627_v21 = vpop.permute.xlu1 %626  ;;  %v622_v22 = vpop.permute.xlu0 %621 }
  0xea   :  { %v1282_v23 = vmul.f32 %v627_v21, %v64_v17  ;;  %v1281_v24 = vmul.f32 %v622_v22, %v63_v18  ;;  %946 = vperm.xlu1 %1584, %v302_v19   ;;  %941 = vperm.xlu0 %1583, %v301_v20   ;;  %v80_v17 = vld [vmem:[%s3342_s1 + $0x228] sm:$0xff]  ;;  %v79_v18 = vld [vmem:[%s3342_s1 + $0x220] sm:$0xff] }
  0xeb   :  { %v318_v19 = vld [vmem:[%s3341_s0 + $0x428] sm:$0xff]  ;;  %v317_v20 = vld [vmem:[%s3341_s0 + $0x420] sm:$0xff] }
  0xec   :  { %1457 = vst.msk [vmem:[%s3343_s2 + $0x1a8] sm:$0xff] %vm1403_vm0, %v1282_v23  ;;  %1456 = vst.msk [vmem:[%s3343_s2 + $0x1a0] sm:$0xff] %vm1403_vm0, %v1281_v24 }
  0xed   :  { %v637_v29 = vpop.permute.xlu1 %636  ;;  %v632_v30 = vpop.permute.xlu0 %631 }
  0xee   :  { %v1284_v31 = vmul.f32 %v637_v29, %v66_v25  ;;  %v1283_v32 = vmul.f32 %v632_v30, %v65_v26  ;;  %956 = vperm.xlu1 %1584, %v304_v27   ;;  %951 = vperm.xlu0 %1583, %v303_v28   ;;  %v82_v25 = vld [vmem:[%s3342_s1 + $0x238] sm:$0xff]  ;;  %v81_v26 = vld [vmem:[%s3342_s1 + $0x230] sm:$0xff] }
  0xef   :  { %v320_v27 = vld [vmem:[%s3341_s0 + $0x438] sm:$0xff]  ;;  %v319_v28 = vld [vmem:[%s3341_s0 + $0x430] sm:$0xff] }
  0xf0   :  { %1459 = vst.msk [vmem:[%s3343_s2 + $0x1b8] sm:$0xff] %vm1403_vm0, %v1284_v31  ;;  %1458 = vst.msk [vmem:[%s3343_s2 + $0x1b0] sm:$0xff] %vm1403_vm0, %v1283_v32 }
  0xf1   :  { %v647_v37 = vpop.permute.xlu1 %646  ;;  %v642_v38 = vpop.permute.xlu0 %641 }
  0xf2   :  { %v1286_v39 = vmul.f32 %v647_v37, %v68_v33  ;;  %v1285_v40 = vmul.f32 %v642_v38, %v67_v34  ;;  %966 = vperm.xlu1 %1584, %v306_v35   ;;  %961 = vperm.xlu0 %1583, %v305_v36   ;;  %v84_v33 = vld [vmem:[%s3342_s1 + $0x248] sm:$0xff]  ;;  %v83_v34 = vld [vmem:[%s3342_s1 + $0x240] sm:$0xff] }
  0xf3   :  { %v322_v35 = vld [vmem:[%s3341_s0 + $0x448] sm:$0xff]  ;;  %v321_v36 = vld [vmem:[%s3341_s0 + $0x440] sm:$0xff] }
  0xf4   :  { %1461 = vst.msk [vmem:[%s3343_s2 + $0x1c8] sm:$0xff] %vm1403_vm0, %v1286_v39  ;;  %1460 = vst.msk [vmem:[%s3343_s2 + $0x1c0] sm:$0xff] %vm1403_vm0, %v1285_v40 }
  0xf5   :  { %v657_v45 = vpop.permute.xlu1 %656  ;;  %v652_v46 = vpop.permute.xlu0 %651 }
  0xf6   :  { %v1288_v47 = vmul.f32 %v657_v45, %v70_v41  ;;  %v1287_v48 = vmul.f32 %v652_v46, %v69_v42  ;;  %976 = vperm.xlu1 %1584, %v308_v43   ;;  %971 = vperm.xlu0 %1583, %v307_v44   ;;  %v86_v41 = vld [vmem:[%s3342_s1 + $0x258] sm:$0xff]  ;;  %v85_v42 = vld [vmem:[%s3342_s1 + $0x250] sm:$0xff] }
  0xf7   :  { %v324_v43 = vld [vmem:[%s3341_s0 + $0x458] sm:$0xff]  ;;  %v323_v44 = vld [vmem:[%s3341_s0 + $0x450] sm:$0xff] }
  0xf8   :  { %1463 = vst.msk [vmem:[%s3343_s2 + $0x1d8] sm:$0xff] %vm1403_vm0, %v1288_v47  ;;  %1462 = vst.msk [vmem:[%s3343_s2 + $0x1d0] sm:$0xff] %vm1403_vm0, %v1287_v48 }
  0xf9   :  { %v667_v53 = vpop.permute.xlu1 %666  ;;  %v662_v54 = vpop.permute.xlu0 %661 }
  0xfa   :  { %v1290_v55 = vmul.f32 %v667_v53, %v72_v49  ;;  %v1289_v56 = vmul.f32 %v662_v54, %v71_v50  ;;  %986 = vperm.xlu1 %1584, %v310_v51   ;;  %981 = vperm.xlu0 %1583, %v309_v52   ;;  %v88_v49 = vld [vmem:[%s3342_s1 + $0x268] sm:$0xff]  ;;  %v87_v50 = vld [vmem:[%s3342_s1 + $0x260] sm:$0xff] }
  0xfb   :  { %v326_v51 = vld [vmem:[%s3341_s0 + $0x468] sm:$0xff]  ;;  %v325_v52 = vld [vmem:[%s3341_s0 + $0x460] sm:$0xff] }
  0xfc   :  { %1465 = vst.msk [vmem:[%s3343_s2 + $0x1e8] sm:$0xff] %vm1403_vm0, %v1290_v55  ;;  %1464 = vst.msk [vmem:[%s3343_s2 + $0x1e0] sm:$0xff] %vm1403_vm0, %v1289_v56 }
  0xfd   :  { %v677_v61 = vpop.permute.xlu1 %676  ;;  %v672_v62 = vpop.permute.xlu0 %671 }
  0xfe   :  { %v1292_v63 = vmul.f32 %v677_v61, %v74_v57  ;;  %v1291_v0 = vmul.f32 %v672_v62, %v73_v58  ;;  %996 = vperm.xlu1 %1584, %v312_v59   ;;  %991 = vperm.xlu0 %1583, %v311_v60   ;;  %v90_v57 = vld [vmem:[%s3342_s1 + $0x278] sm:$0xff]  ;;  %v89_v58 = vld [vmem:[%s3342_s1 + $0x270] sm:$0xff] }
  0xff   :  { %v328_v59 = vld [vmem:[%s3341_s0 + $0x478] sm:$0xff]  ;;  %v327_v60 = vld [vmem:[%s3341_s0 + $0x470] sm:$0xff] }
 0x100   :  { %1467 = vst.msk [vmem:[%s3343_s2 + $0x1f8] sm:$0xff] %vm1403_vm0, %v1292_v63  ;;  %1466 = vst.msk [vmem:[%s3343_s2 + $0x1f0] sm:$0xff] %vm1403_vm0, %v1291_v0 }
 0x101   :  { %v687_v5 = vpop.permute.xlu1 %686  ;;  %v682_v6 = vpop.permute.xlu0 %681 }
 0x102   :  { %v1294_v7 = vmul.f32 %v687_v5, %v76_v1  ;;  %v1293_v8 = vmul.f32 %v682_v6, %v75_v2  ;;  %1006 = vperm.xlu1 %1584, %v314_v3   ;;  %1001 = vperm.xlu0 %1583, %v313_v4   ;;  %v92_v1 = vld [vmem:[%s3342_s1 + $0x288] sm:$0xff]  ;;  %v91_v2 = vld [vmem:[%s3342_s1 + $0x280] sm:$0xff] }
 0x103   :  { %v330_v3 = vld [vmem:[%s3341_s0 + $0x488] sm:$0xff]  ;;  %v329_v4 = vld [vmem:[%s3341_s0 + $0x480] sm:$0xff] }
 0x104   :  { %1469 = vst.msk [vmem:[%s3343_s2 + $0x208] sm:$0xff] %vm1403_vm0, %v1294_v7  ;;  %1468 = vst.msk [vmem:[%s3343_s2 + $0x200] sm:$0xff] %vm1403_vm0, %v1293_v8 }
 0x105   :  { %v697_v13 = vpop.permute.xlu1 %696  ;;  %v692_v14 = vpop.permute.xlu0 %691 }
 0x106   :  { %v1296_v15 = vmul.f32 %v697_v13, %v78_v9  ;;  %v1295_v16 = vmul.f32 %v692_v14, %v77_v10  ;;  %1016 = vperm.xlu1 %1584, %v316_v11   ;;  %1011 = vperm.xlu0 %1583, %v315_v12   ;;  %v94_v9 = vld [vmem:[%s3342_s1 + $0x298] sm:$0xff]  ;;  %v93_v10 = vld [vmem:[%s3342_s1 + $0x290] sm:$0xff] }
 0x107   :  { %v332_v11 = vld [vmem:[%s3341_s0 + $0x498] sm:$0xff]  ;;  %v331_v12 = vld [vmem:[%s3341_s0 + $0x490] sm:$0xff] }
 0x108   :  { %1471 = vst.msk [vmem:[%s3343_s2 + $0x218] sm:$0xff] %vm1403_vm0, %v1296_v15  ;;  %1470 = vst.msk [vmem:[%s3343_s2 + $0x210] sm:$0xff] %vm1403_vm0, %v1295_v16 }
 0x109   :  { %v707_v21 = vpop.permute.xlu1 %706  ;;  %v702_v22 = vpop.permute.xlu0 %701 }
 0x10a   :  { %v1298_v23 = vmul.f32 %v707_v21, %v80_v17  ;;  %v1297_v24 = vmul.f32 %v702_v22, %v79_v18  ;;  %1026 = vperm.xlu1 %1584, %v318_v19   ;;  %1021 = vperm.xlu0 %1583, %v317_v20   ;;  %v96_v17 = vld [vmem:[%s3342_s1 + $0x2a8] sm:$0xff]  ;;  %v95_v18 = vld [vmem:[%s3342_s1 + $0x2a0] sm:$0xff] }
 0x10b   :  { %v334_v19 = vld [vmem:[%s3341_s0 + $0x4a8] sm:$0xff]  ;;  %v333_v20 = vld [vmem:[%s3341_s0 + $0x4a0] sm:$0xff] }
 0x10c   :  { %1473 = vst.msk [vmem:[%s3343_s2 + $0x228] sm:$0xff] %vm1403_vm0, %v1298_v23  ;;  %1472 = vst.msk [vmem:[%s3343_s2 + $0x220] sm:$0xff] %vm1403_vm0, %v1297_v24 }
 0x10d   :  { %v717_v29 = vpop.permute.xlu1 %716  ;;  %v712_v30 = vpop.permute.xlu0 %711 }
 0x10e   :  { %v1300_v31 = vmul.f32 %v717_v29, %v82_v25  ;;  %v1299_v32 = vmul.f32 %v712_v30, %v81_v26  ;;  %1036 = vperm.xlu1 %1584, %v320_v27   ;;  %1031 = vperm.xlu0 %1583, %v319_v28   ;;  %v98_v25 = vld [vmem:[%s3342_s1 + $0x2b8] sm:$0xff]  ;;  %v97_v26 = vld [vmem:[%s3342_s1 + $0x2b0] sm:$0xff] }
 0x10f   :  { %v336_v27 = vld [vmem:[%s3341_s0 + $0x4b8] sm:$0xff]  ;;  %v335_v28 = vld [vmem:[%s3341_s0 + $0x4b0] sm:$0xff] }
 0x110   :  { %1475 = vst.msk [vmem:[%s3343_s2 + $0x238] sm:$0xff] %vm1403_vm0, %v1300_v31  ;;  %1474 = vst.msk [vmem:[%s3343_s2 + $0x230] sm:$0xff] %vm1403_vm0, %v1299_v32 }
 0x111   :  { %v727_v37 = vpop.permute.xlu1 %726  ;;  %v722_v38 = vpop.permute.xlu0 %721 }
 0x112   :  { %v1302_v39 = vmul.f32 %v727_v37, %v84_v33  ;;  %v1301_v40 = vmul.f32 %v722_v38, %v83_v34  ;;  %1046 = vperm.xlu1 %1584, %v322_v35   ;;  %1041 = vperm.xlu0 %1583, %v321_v36   ;;  %v100_v33 = vld [vmem:[%s3342_s1 + $0x2c8] sm:$0xff]  ;;  %v99_v34 = vld [vmem:[%s3342_s1 + $0x2c0] sm:$0xff] }
 0x113   :  { %v338_v35 = vld [vmem:[%s3341_s0 + $0x4c8] sm:$0xff]  ;;  %v337_v36 = vld [vmem:[%s3341_s0 + $0x4c0] sm:$0xff] }
 0x114   :  { %1477 = vst.msk [vmem:[%s3343_s2 + $0x248] sm:$0xff] %vm1403_vm0, %v1302_v39  ;;  %1476 = vst.msk [vmem:[%s3343_s2 + $0x240] sm:$0xff] %vm1403_vm0, %v1301_v40 }
 0x115   :  { %v737_v45 = vpop.permute.xlu1 %736  ;;  %v732_v46 = vpop.permute.xlu0 %731 }
 0x116   :  { %v1304_v47 = vmul.f32 %v737_v45, %v86_v41  ;;  %v1303_v48 = vmul.f32 %v732_v46, %v85_v42  ;;  %1056 = vperm.xlu1 %1584, %v324_v43   ;;  %1051 = vperm.xlu0 %1583, %v323_v44   ;;  %v102_v41 = vld [vmem:[%s3342_s1 + $0x2d8] sm:$0xff]  ;;  %v101_v42 = vld [vmem:[%s3342_s1 + $0x2d0] sm:$0xff] }
 0x117   :  { %v340_v43 = vld [vmem:[%s3341_s0 + $0x4d8] sm:$0xff]  ;;  %v339_v44 = vld [vmem:[%s3341_s0 + $0x4d0] sm:$0xff] }
 0x118   :  { %1479 = vst.msk [vmem:[%s3343_s2 + $0x258] sm:$0xff] %vm1403_vm0, %v1304_v47  ;;  %1478 = vst.msk [vmem:[%s3343_s2 + $0x250] sm:$0xff] %vm1403_vm0, %v1303_v48 }
 0x119   :  { %v747_v53 = vpop.permute.xlu1 %746  ;;  %v742_v54 = vpop.permute.xlu0 %741 }
 0x11a   :  { %v1306_v55 = vmul.f32 %v747_v53, %v88_v49  ;;  %v1305_v56 = vmul.f32 %v742_v54, %v87_v50  ;;  %1066 = vperm.xlu1 %1584, %v326_v51   ;;  %1061 = vperm.xlu0 %1583, %v325_v52   ;;  %v104_v49 = vld [vmem:[%s3342_s1 + $0x2e8] sm:$0xff]  ;;  %v103_v50 = vld [vmem:[%s3342_s1 + $0x2e0] sm:$0xff] }
 0x11b   :  { %v342_v51 = vld [vmem:[%s3341_s0 + $0x4e8] sm:$0xff]  ;;  %v341_v52 = vld [vmem:[%s3341_s0 + $0x4e0] sm:$0xff] }
 0x11c   :  { %1481 = vst.msk [vmem:[%s3343_s2 + $0x268] sm:$0xff] %vm1403_vm0, %v1306_v55  ;;  %1480 = vst.msk [vmem:[%s3343_s2 + $0x260] sm:$0xff] %vm1403_vm0, %v1305_v56 }
 0x11d   :  { %v757_v61 = vpop.permute.xlu1 %756  ;;  %v752_v62 = vpop.permute.xlu0 %751 }
 0x11e   :  { %v1308_v63 = vmul.f32 %v757_v61, %v90_v57  ;;  %v1307_v0 = vmul.f32 %v752_v62, %v89_v58  ;;  %1076 = vperm.xlu1 %1584, %v328_v59   ;;  %1071 = vperm.xlu0 %1583, %v327_v60   ;;  %v106_v57 = vld [vmem:[%s3342_s1 + $0x2f8] sm:$0xff]  ;;  %v105_v58 = vld [vmem:[%s3342_s1 + $0x2f0] sm:$0xff] }
 0x11f   :  { %v344_v59 = vld [vmem:[%s3341_s0 + $0x4f8] sm:$0xff]  ;;  %v343_v60 = vld [vmem:[%s3341_s0 + $0x4f0] sm:$0xff] }
 0x120   :  { %1483 = vst.msk [vmem:[%s3343_s2 + $0x278] sm:$0xff] %vm1403_vm0, %v1308_v63  ;;  %1482 = vst.msk [vmem:[%s3343_s2 + $0x270] sm:$0xff] %vm1403_vm0, %v1307_v0 }
 0x121   :  { %v767_v5 = vpop.permute.xlu1 %766  ;;  %v762_v6 = vpop.permute.xlu0 %761 }
 0x122   :  { %v1310_v7 = vmul.f32 %v767_v5, %v92_v1  ;;  %v1309_v8 = vmul.f32 %v762_v6, %v91_v2  ;;  %1086 = vperm.xlu1 %1584, %v330_v3   ;;  %1081 = vperm.xlu0 %1583, %v329_v4   ;;  %v108_v1 = vld [vmem:[%s3342_s1 + $0x308] sm:$0xff]  ;;  %v107_v2 = vld [vmem:[%s3342_s1 + $0x300] sm:$0xff] }
 0x123   :  { %v346_v3 = vld [vmem:[%s3341_s0 + $0x508] sm:$0xff]  ;;  %v345_v4 = vld [vmem:[%s3341_s0 + $0x500] sm:$0xff] }
 0x124   :  { %1485 = vst.msk [vmem:[%s3343_s2 + $0x288] sm:$0xff] %vm1403_vm0, %v1310_v7  ;;  %1484 = vst.msk [vmem:[%s3343_s2 + $0x280] sm:$0xff] %vm1403_vm0, %v1309_v8 }
 0x125   :  { %v777_v13 = vpop.permute.xlu1 %776  ;;  %v772_v14 = vpop.permute.xlu0 %771 }
 0x126   :  { %v1312_v15 = vmul.f32 %v777_v13, %v94_v9  ;;  %v1311_v16 = vmul.f32 %v772_v14, %v93_v10  ;;  %1096 = vperm.xlu1 %1584, %v332_v11   ;;  %1091 = vperm.xlu0 %1583, %v331_v12   ;;  %v110_v9 = vld [vmem:[%s3342_s1 + $0x318] sm:$0xff]  ;;  %v109_v10 = vld [vmem:[%s3342_s1 + $0x310] sm:$0xff] }
 0x127   :  { %v348_v11 = vld [vmem:[%s3341_s0 + $0x518] sm:$0xff]  ;;  %v347_v12 = vld [vmem:[%s3341_s0 + $0x510] sm:$0xff] }
 0x128   :  { %1487 = vst.msk [vmem:[%s3343_s2 + $0x298] sm:$0xff] %vm1403_vm0, %v1312_v15  ;;  %1486 = vst.msk [vmem:[%s3343_s2 + $0x290] sm:$0xff] %vm1403_vm0, %v1311_v16 }
 0x129   :  { %v787_v21 = vpop.permute.xlu1 %786  ;;  %v782_v22 = vpop.permute.xlu0 %781 }
 0x12a   :  { %v1314_v23 = vmul.f32 %v787_v21, %v96_v17  ;;  %v1313_v24 = vmul.f32 %v782_v22, %v95_v18  ;;  %1106 = vperm.xlu1 %1584, %v334_v19   ;;  %1101 = vperm.xlu0 %1583, %v333_v20   ;;  %v112_v17 = vld [vmem:[%s3342_s1 + $0x328] sm:$0xff]  ;;  %v111_v18 = vld [vmem:[%s3342_s1 + $0x320] sm:$0xff] }
 0x12b   :  { %v350_v19 = vld [vmem:[%s3341_s0 + $0x528] sm:$0xff]  ;;  %v349_v20 = vld [vmem:[%s3341_s0 + $0x520] sm:$0xff] }
 0x12c   :  { %1489 = vst.msk [vmem:[%s3343_s2 + $0x2a8] sm:$0xff] %vm1403_vm0, %v1314_v23  ;;  %1488 = vst.msk [vmem:[%s3343_s2 + $0x2a0] sm:$0xff] %vm1403_vm0, %v1313_v24 }
 0x12d   :  { %v797_v29 = vpop.permute.xlu1 %796  ;;  %v792_v30 = vpop.permute.xlu0 %791 }
 0x12e   :  { %v1316_v31 = vmul.f32 %v797_v29, %v98_v25  ;;  %v1315_v32 = vmul.f32 %v792_v30, %v97_v26  ;;  %1116 = vperm.xlu1 %1584, %v336_v27   ;;  %1111 = vperm.xlu0 %1583, %v335_v28   ;;  %v114_v25 = vld [vmem:[%s3342_s1 + $0x338] sm:$0xff]  ;;  %v113_v26 = vld [vmem:[%s3342_s1 + $0x330] sm:$0xff] }
 0x12f   :  { %v352_v27 = vld [vmem:[%s3341_s0 + $0x538] sm:$0xff]  ;;  %v351_v28 = vld [vmem:[%s3341_s0 + $0x530] sm:$0xff] }
 0x130   :  { %1491 = vst.msk [vmem:[%s3343_s2 + $0x2b8] sm:$0xff] %vm1403_vm0, %v1316_v31  ;;  %1490 = vst.msk [vmem:[%s3343_s2 + $0x2b0] sm:$0xff] %vm1403_vm0, %v1315_v32 }
 0x131   :  { %v807_v37 = vpop.permute.xlu1 %806  ;;  %v802_v38 = vpop.permute.xlu0 %801 }
 0x132   :  { %v1318_v39 = vmul.f32 %v807_v37, %v100_v33  ;;  %v1317_v40 = vmul.f32 %v802_v38, %v99_v34  ;;  %1126 = vperm.xlu1 %1584, %v338_v35   ;;  %1121 = vperm.xlu0 %1583, %v337_v36   ;;  %v116_v33 = vld [vmem:[%s3342_s1 + $0x348] sm:$0xff]  ;;  %v115_v34 = vld [vmem:[%s3342_s1 + $0x340] sm:$0xff] }
 0x133   :  { %v354_v35 = vld [vmem:[%s3341_s0 + $0x548] sm:$0xff]  ;;  %v353_v36 = vld [vmem:[%s3341_s0 + $0x540] sm:$0xff] }
 0x134   :  { %1493 = vst.msk [vmem:[%s3343_s2 + $0x2c8] sm:$0xff] %vm1403_vm0, %v1318_v39  ;;  %1492 = vst.msk [vmem:[%s3343_s2 + $0x2c0] sm:$0xff] %vm1403_vm0, %v1317_v40 }
 0x135   :  { %v817_v45 = vpop.permute.xlu1 %816  ;;  %v812_v46 = vpop.permute.xlu0 %811 }
 0x136   :  { %v1320_v47 = vmul.f32 %v817_v45, %v102_v41  ;;  %v1319_v48 = vmul.f32 %v812_v46, %v101_v42  ;;  %1136 = vperm.xlu1 %1584, %v340_v43   ;;  %1131 = vperm.xlu0 %1583, %v339_v44   ;;  %v118_v41 = vld [vmem:[%s3342_s1 + $0x358] sm:$0xff]  ;;  %v117_v42 = vld [vmem:[%s3342_s1 + $0x350] sm:$0xff] }
 0x137   :  { %v356_v43 = vld [vmem:[%s3341_s0 + $0x558] sm:$0xff]  ;;  %v355_v44 = vld [vmem:[%s3341_s0 + $0x550] sm:$0xff] }
 0x138   :  { %1495 = vst.msk [vmem:[%s3343_s2 + $0x2d8] sm:$0xff] %vm1403_vm0, %v1320_v47  ;;  %1494 = vst.msk [vmem:[%s3343_s2 + $0x2d0] sm:$0xff] %vm1403_vm0, %v1319_v48 }
 0x139   :  { %v827_v53 = vpop.permute.xlu1 %826  ;;  %v822_v54 = vpop.permute.xlu0 %821 }
 0x13a   :  { %v1322_v55 = vmul.f32 %v827_v53, %v104_v49  ;;  %v1321_v56 = vmul.f32 %v822_v54, %v103_v50  ;;  %1146 = vperm.xlu1 %1584, %v342_v51   ;;  %1141 = vperm.xlu0 %1583, %v341_v52   ;;  %v120_v49 = vld [vmem:[%s3342_s1 + $0x368] sm:$0xff]  ;;  %v119_v50 = vld [vmem:[%s3342_s1 + $0x360] sm:$0xff] }
 0x13b   :  { %v358_v51 = vld [vmem:[%s3341_s0 + $0x568] sm:$0xff]  ;;  %v357_v52 = vld [vmem:[%s3341_s0 + $0x560] sm:$0xff] }
 0x13c   :  { %1497 = vst.msk [vmem:[%s3343_s2 + $0x2e8] sm:$0xff] %vm1403_vm0, %v1322_v55  ;;  %1496 = vst.msk [vmem:[%s3343_s2 + $0x2e0] sm:$0xff] %vm1403_vm0, %v1321_v56 }
 0x13d   :  { %v837_v61 = vpop.permute.xlu1 %836  ;;  %v832_v62 = vpop.permute.xlu0 %831 }
 0x13e   :  { %v1324_v63 = vmul.f32 %v837_v61, %v106_v57  ;;  %v1323_v0 = vmul.f32 %v832_v62, %v105_v58  ;;  %1156 = vperm.xlu1 %1584, %v344_v59   ;;  %1151 = vperm.xlu0 %1583, %v343_v60   ;;  %v122_v57 = vld [vmem:[%s3342_s1 + $0x378] sm:$0xff]  ;;  %v121_v58 = vld [vmem:[%s3342_s1 + $0x370] sm:$0xff] }
 0x140   :  { %1499 = vst.msk [vmem:[%s3343_s2 + $0x2f8] sm:$0xff] %vm1403_vm0, %v1324_v63  ;;  %1498 = vst.msk [vmem:[%s3343_s2 + $0x2f0] sm:$0xff] %vm1403_vm0, %v1323_v0  ;;  %v124_v63 = vld [vmem:[%s3342_s1 + $0x388] sm:$0xff]  ;;  %v123_v0 = vld [vmem:[%s3342_s1 + $0x380] sm:$0xff] }
 0x141   :  { %v847_v5 = vpop.permute.xlu1 %846  ;;  %v842_v6 = vpop.permute.xlu0 %841 }
 0x142   :  { %v1326_v7 = vmul.f32 %v847_v5, %v108_v1  ;;  %v1325_v8 = vmul.f32 %v842_v6, %v107_v2  ;;  %1166 = vperm.xlu1 %1584, %v346_v3   ;;  %1161 = vperm.xlu0 %1583, %v345_v4   ;;  %v126_v5 = vld [vmem:[%s3342_s1 + $0x398] sm:$0xff]  ;;  %v125_v6 = vld [vmem:[%s3342_s1 + $0x390] sm:$0xff] }
 0x144   :  { %1501 = vst.msk [vmem:[%s3343_s2 + $0x308] sm:$0xff] %vm1403_vm0, %v1326_v7  ;;  %1500 = vst.msk [vmem:[%s3343_s2 + $0x300] sm:$0xff] %vm1403_vm0, %v1325_v8 }
 0x145   :  { %v857_v13 = vpop.permute.xlu1 %856  ;;  %v852_v14 = vpop.permute.xlu0 %851 }
 0x146   :  { %v1328_v15 = vmul.f32 %v857_v13, %v110_v9  ;;  %v1327_v16 = vmul.f32 %v852_v14, %v109_v10  ;;  %1176 = vperm.xlu1 %1584, %v348_v11   ;;  %1171 = vperm.xlu0 %1583, %v347_v12   ;;  %v128_v11 = vld [vmem:[%s3342_s1 + $0x3a8] sm:$0xff]  ;;  %v127_v12 = vld [vmem:[%s3342_s1 + $0x3a0] sm:$0xff] }
 0x148   :  { %1503 = vst.msk [vmem:[%s3343_s2 + $0x318] sm:$0xff] %vm1403_vm0, %v1328_v15  ;;  %1502 = vst.msk [vmem:[%s3343_s2 + $0x310] sm:$0xff] %vm1403_vm0, %v1327_v16 }
 0x149   :  { %v867_v21 = vpop.permute.xlu1 %866  ;;  %v862_v22 = vpop.permute.xlu0 %861 }
 0x14a   :  { %v1330_v23 = vmul.f32 %v867_v21, %v112_v17  ;;  %v1329_v24 = vmul.f32 %v862_v22, %v111_v18  ;;  %1186 = vperm.xlu1 %1584, %v350_v19   ;;  %1181 = vperm.xlu0 %1583, %v349_v20   ;;  %v130_v17 = vld [vmem:[%s3342_s1 + $0x3b8] sm:$0xff]  ;;  %v129_v18 = vld [vmem:[%s3342_s1 + $0x3b0] sm:$0xff] }
 0x14c   :  { %1505 = vst.msk [vmem:[%s3343_s2 + $0x328] sm:$0xff] %vm1403_vm0, %v1330_v23  ;;  %1504 = vst.msk [vmem:[%s3343_s2 + $0x320] sm:$0xff] %vm1403_vm0, %v1329_v24  ;;  %v132_v23 = vld [vmem:[%s3342_s1 + $0x3c8] sm:$0xff]  ;;  %v131_v24 = vld [vmem:[%s3342_s1 + $0x3c0] sm:$0xff] }
 0x14d   :  { %v877_v29 = vpop.permute.xlu1 %876  ;;  %v872_v30 = vpop.permute.xlu0 %871 }
 0x14e   :  { %v1332_v31 = vmul.f32 %v877_v29, %v114_v25  ;;  %v1331_v32 = vmul.f32 %v872_v30, %v113_v26  ;;  %1196 = vperm.xlu1 %1584, %v352_v27   ;;  %1191 = vperm.xlu0 %1583, %v351_v28   ;;  %v134_v29 = vld [vmem:[%s3342_s1 + $0x3d8] sm:$0xff]  ;;  %v133_v30 = vld [vmem:[%s3342_s1 + $0x3d0] sm:$0xff] }
 0x150   :  { %1507 = vst.msk [vmem:[%s3343_s2 + $0x338] sm:$0xff] %vm1403_vm0, %v1332_v31  ;;  %1506 = vst.msk [vmem:[%s3343_s2 + $0x330] sm:$0xff] %vm1403_vm0, %v1331_v32 }
 0x151   :  { %v887_v37 = vpop.permute.xlu1 %886  ;;  %v882_v38 = vpop.permute.xlu0 %881 }
 0x152   :  { %v1334_v39 = vmul.f32 %v887_v37, %v116_v33  ;;  %v1333_v40 = vmul.f32 %v882_v38, %v115_v34  ;;  %1206 = vperm.xlu1 %1584, %v354_v35   ;;  %1201 = vperm.xlu0 %1583, %v353_v36   ;;  %v136_v35 = vld [vmem:[%s3342_s1 + $0x3e8] sm:$0xff]  ;;  %v135_v36 = vld [vmem:[%s3342_s1 + $0x3e0] sm:$0xff] }
 0x154   :  { %1509 = vst.msk [vmem:[%s3343_s2 + $0x348] sm:$0xff] %vm1403_vm0, %v1334_v39  ;;  %1508 = vst.msk [vmem:[%s3343_s2 + $0x340] sm:$0xff] %vm1403_vm0, %v1333_v40 }
 0x155   :  { %v897_v45 = vpop.permute.xlu1 %896  ;;  %v892_v46 = vpop.permute.xlu0 %891 }
 0x156   :  { %v1336_v47 = vmul.f32 %v897_v45, %v118_v41  ;;  %v1335_v48 = vmul.f32 %v892_v46, %v117_v42  ;;  %1216 = vperm.xlu1 %1584, %v356_v43   ;;  %1211 = vperm.xlu0 %1583, %v355_v44   ;;  %v138_v41 = vld [vmem:[%s3342_s1 + $0x3f8] sm:$0xff]  ;;  %v137_v42 = vld [vmem:[%s3342_s1 + $0x3f0] sm:$0xff] }
 0x158   :  { %1511 = vst.msk [vmem:[%s3343_s2 + $0x358] sm:$0xff] %vm1403_vm0, %v1336_v47  ;;  %1510 = vst.msk [vmem:[%s3343_s2 + $0x350] sm:$0xff] %vm1403_vm0, %v1335_v48  ;;  %v140_v47 = vld [vmem:[%s3342_s1 + $0x408] sm:$0xff]  ;;  %v139_v48 = vld [vmem:[%s3342_s1 + $0x400] sm:$0xff] }
 0x159   :  { %v907_v53 = vpop.permute.xlu1 %906  ;;  %v902_v54 = vpop.permute.xlu0 %901 }
 0x15a   :  { %v1338_v55 = vmul.f32 %v907_v53, %v120_v49  ;;  %v1337_v56 = vmul.f32 %v902_v54, %v119_v50  ;;  %1226 = vperm.xlu1 %1584, %v358_v51   ;;  %1221 = vperm.xlu0 %1583, %v357_v52   ;;  %v142_v53 = vld [vmem:[%s3342_s1 + $0x418] sm:$0xff]  ;;  %v141_v54 = vld [vmem:[%s3342_s1 + $0x410] sm:$0xff] }
 0x15c   :  { %1513 = vst.msk [vmem:[%s3343_s2 + $0x368] sm:$0xff] %vm1403_vm0, %v1338_v55  ;;  %1512 = vst.msk [vmem:[%s3343_s2 + $0x360] sm:$0xff] %vm1403_vm0, %v1337_v56 }
 0x15d   :  { %v917_v59 = vpop.permute.xlu1 %916  ;;  %v912_v60 = vpop.permute.xlu0 %911 }
 0x15e   :  { %v1340_v61 = vmul.f32 %v917_v59, %v122_v57  ;;  %v1339_v62 = vmul.f32 %v912_v60, %v121_v58  ;;  %v144_v59 = vld [vmem:[%s3342_s1 + $0x428] sm:$0xff]  ;;  %v143_v60 = vld [vmem:[%s3342_s1 + $0x420] sm:$0xff] }
 0x160   :  { %1515 = vst.msk [vmem:[%s3343_s2 + $0x378] sm:$0xff] %vm1403_vm0, %v1340_v61  ;;  %1514 = vst.msk [vmem:[%s3343_s2 + $0x370] sm:$0xff] %vm1403_vm0, %v1339_v62 }
 0x161   :  { %v927_v1 = vpop.permute.xlu1 %926  ;;  %v922_v2 = vpop.permute.xlu0 %921 }
 0x162   :  { %v1342_v3 = vmul.f32 %v927_v1, %v124_v63  ;;  %v1341_v4 = vmul.f32 %v922_v2, %v123_v0  ;;  %v146_v1 = vld [vmem:[%s3342_s1 + $0x438] sm:$0xff]  ;;  %v145_v2 = vld [vmem:[%s3342_s1 + $0x430] sm:$0xff] }
 0x164   :  { %1517 = vst.msk [vmem:[%s3343_s2 + $0x388] sm:$0xff] %vm1403_vm0, %v1342_v3  ;;  %1516 = vst.msk [vmem:[%s3343_s2 + $0x380] sm:$0xff] %vm1403_vm0, %v1341_v4 }
 0x165   :  { %v937_v7 = vpop.permute.xlu1 %936  ;;  %v932_v8 = vpop.permute.xlu0 %931 }
 0x166   :  { %v1344_v9 = vmul.f32 %v937_v7, %v126_v5  ;;  %v1343_v10 = vmul.f32 %v932_v8, %v125_v6  ;;  %v148_v7 = vld [vmem:[%s3342_s1 + $0x448] sm:$0xff]  ;;  %v147_v8 = vld [vmem:[%s3342_s1 + $0x440] sm:$0xff] }
 0x168   :  { %1519 = vst.msk [vmem:[%s3343_s2 + $0x398] sm:$0xff] %vm1403_vm0, %v1344_v9  ;;  %1518 = vst.msk [vmem:[%s3343_s2 + $0x390] sm:$0xff] %vm1403_vm0, %v1343_v10 }
 0x169   :  { %v947_v13 = vpop.permute.xlu1 %946  ;;  %v942_v14 = vpop.permute.xlu0 %941 }
 0x16a   :  { %v1346_v15 = vmul.f32 %v947_v13, %v128_v11  ;;  %v1345_v16 = vmul.f32 %v942_v14, %v127_v12  ;;  %v150_v13 = vld [vmem:[%s3342_s1 + $0x458] sm:$0xff]  ;;  %v149_v14 = vld [vmem:[%s3342_s1 + $0x450] sm:$0xff] }
 0x16c   :  { %1521 = vst.msk [vmem:[%s3343_s2 + $0x3a8] sm:$0xff] %vm1403_vm0, %v1346_v15  ;;  %1520 = vst.msk [vmem:[%s3343_s2 + $0x3a0] sm:$0xff] %vm1403_vm0, %v1345_v16 }
 0x16d   :  { %v957_v19 = vpop.permute.xlu1 %956  ;;  %v952_v20 = vpop.permute.xlu0 %951 }
 0x16e   :  { %v1348_v21 = vmul.f32 %v957_v19, %v130_v17  ;;  %v1347_v22 = vmul.f32 %v952_v20, %v129_v18  ;;  %v152_v19 = vld [vmem:[%s3342_s1 + $0x468] sm:$0xff]  ;;  %v151_v20 = vld [vmem:[%s3342_s1 + $0x460] sm:$0xff] }
 0x170   :  { %1523 = vst.msk [vmem:[%s3343_s2 + $0x3b8] sm:$0xff] %vm1403_vm0, %v1348_v21  ;;  %1522 = vst.msk [vmem:[%s3343_s2 + $0x3b0] sm:$0xff] %vm1403_vm0, %v1347_v22 }
 0x171   :  { %v967_v25 = vpop.permute.xlu1 %966  ;;  %v962_v26 = vpop.permute.xlu0 %961 }
 0x172   :  { %v1350_v27 = vmul.f32 %v967_v25, %v132_v23  ;;  %v1349_v28 = vmul.f32 %v962_v26, %v131_v24  ;;  %v154_v25 = vld [vmem:[%s3342_s1 + $0x478] sm:$0xff]  ;;  %v153_v26 = vld [vmem:[%s3342_s1 + $0x470] sm:$0xff] }
 0x174   :  { %1525 = vst.msk [vmem:[%s3343_s2 + $0x3c8] sm:$0xff] %vm1403_vm0, %v1350_v27  ;;  %1524 = vst.msk [vmem:[%s3343_s2 + $0x3c0] sm:$0xff] %vm1403_vm0, %v1349_v28 }
 0x175   :  { %v977_v31 = vpop.permute.xlu1 %976  ;;  %v972_v32 = vpop.permute.xlu0 %971 }
 0x176   :  { %v1352_v33 = vmul.f32 %v977_v31, %v134_v29  ;;  %v1351_v34 = vmul.f32 %v972_v32, %v133_v30  ;;  %v156_v31 = vld [vmem:[%s3342_s1 + $0x488] sm:$0xff]  ;;  %v155_v32 = vld [vmem:[%s3342_s1 + $0x480] sm:$0xff] }
 0x178   :  { %1527 = vst.msk [vmem:[%s3343_s2 + $0x3d8] sm:$0xff] %vm1403_vm0, %v1352_v33  ;;  %1526 = vst.msk [vmem:[%s3343_s2 + $0x3d0] sm:$0xff] %vm1403_vm0, %v1351_v34 }
 0x179   :  { %v987_v37 = vpop.permute.xlu1 %986  ;;  %v982_v38 = vpop.permute.xlu0 %981 }
 0x17a   :  { %v1354_v39 = vmul.f32 %v987_v37, %v136_v35  ;;  %v1353_v40 = vmul.f32 %v982_v38, %v135_v36  ;;  %v158_v37 = vld [vmem:[%s3342_s1 + $0x498] sm:$0xff]  ;;  %v157_v38 = vld [vmem:[%s3342_s1 + $0x490] sm:$0xff] }
 0x17c   :  { %1529 = vst.msk [vmem:[%s3343_s2 + $0x3e8] sm:$0xff] %vm1403_vm0, %v1354_v39  ;;  %1528 = vst.msk [vmem:[%s3343_s2 + $0x3e0] sm:$0xff] %vm1403_vm0, %v1353_v40 }
 0x17d   :  { %v997_v43 = vpop.permute.xlu1 %996  ;;  %v992_v44 = vpop.permute.xlu0 %991 }
 0x17e   :  { %v1356_v45 = vmul.f32 %v997_v43, %v138_v41  ;;  %v1355_v46 = vmul.f32 %v992_v44, %v137_v42  ;;  %v160_v43 = vld [vmem:[%s3342_s1 + $0x4a8] sm:$0xff]  ;;  %v159_v44 = vld [vmem:[%s3342_s1 + $0x4a0] sm:$0xff] }
 0x180   :  { %1531 = vst.msk [vmem:[%s3343_s2 + $0x3f8] sm:$0xff] %vm1403_vm0, %v1356_v45  ;;  %1530 = vst.msk [vmem:[%s3343_s2 + $0x3f0] sm:$0xff] %vm1403_vm0, %v1355_v46 }
 0x181   :  { %v1007_v49 = vpop.permute.xlu1 %1006  ;;  %v1002_v50 = vpop.permute.xlu0 %1001 }
 0x182   :  { %v1358_v51 = vmul.f32 %v1007_v49, %v140_v47  ;;  %v1357_v52 = vmul.f32 %v1002_v50, %v139_v48  ;;  %v162_v49 = vld [vmem:[%s3342_s1 + $0x4b8] sm:$0xff]  ;;  %v161_v50 = vld [vmem:[%s3342_s1 + $0x4b0] sm:$0xff] }
 0x184   :  { %1533 = vst.msk [vmem:[%s3343_s2 + $0x408] sm:$0xff] %vm1403_vm0, %v1358_v51  ;;  %1532 = vst.msk [vmem:[%s3343_s2 + $0x400] sm:$0xff] %vm1403_vm0, %v1357_v52 }
 0x185   :  { %v1017_v55 = vpop.permute.xlu1 %1016  ;;  %v1012_v56 = vpop.permute.xlu0 %1011 }
 0x186   :  { %v1360_v57 = vmul.f32 %v1017_v55, %v142_v53  ;;  %v1359_v58 = vmul.f32 %v1012_v56, %v141_v54  ;;  %v164_v55 = vld [vmem:[%s3342_s1 + $0x4c8] sm:$0xff]  ;;  %v163_v56 = vld [vmem:[%s3342_s1 + $0x4c0] sm:$0xff] }
 0x188   :  { %1535 = vst.msk [vmem:[%s3343_s2 + $0x418] sm:$0xff] %vm1403_vm0, %v1360_v57  ;;  %1534 = vst.msk [vmem:[%s3343_s2 + $0x410] sm:$0xff] %vm1403_vm0, %v1359_v58 }
 0x189   :  { %v1027_v61 = vpop.permute.xlu1 %1026  ;;  %v1022_v62 = vpop.permute.xlu0 %1021 }
 0x18a   :  { %v1362_v63 = vmul.f32 %v1027_v61, %v144_v59  ;;  %v1361_v0 = vmul.f32 %v1022_v62, %v143_v60  ;;  %v166_v61 = vld [vmem:[%s3342_s1 + $0x4d8] sm:$0xff]  ;;  %v165_v62 = vld [vmem:[%s3342_s1 + $0x4d0] sm:$0xff] }
 0x18c   :  { %1537 = vst.msk [vmem:[%s3343_s2 + $0x428] sm:$0xff] %vm1403_vm0, %v1362_v63  ;;  %1536 = vst.msk [vmem:[%s3343_s2 + $0x420] sm:$0xff] %vm1403_vm0, %v1361_v0 }
 0x18d   :  { %v1037_v3 = vpop.permute.xlu1 %1036  ;;  %v1032_v4 = vpop.permute.xlu0 %1031 }
 0x18e   :  { %v1364_v5 = vmul.f32 %v1037_v3, %v146_v1  ;;  %v1363_v6 = vmul.f32 %v1032_v4, %v145_v2  ;;  %v168_v3 = vld [vmem:[%s3342_s1 + $0x4e8] sm:$0xff]  ;;  %v167_v4 = vld [vmem:[%s3342_s1 + $0x4e0] sm:$0xff] }
 0x190   :  { %1539 = vst.msk [vmem:[%s3343_s2 + $0x438] sm:$0xff] %vm1403_vm0, %v1364_v5  ;;  %1538 = vst.msk [vmem:[%s3343_s2 + $0x430] sm:$0xff] %vm1403_vm0, %v1363_v6 }
 0x191   :  { %v1047_v9 = vpop.permute.xlu1 %1046  ;;  %v1042_v10 = vpop.permute.xlu0 %1041 }
 0x192   :  { %v1366_v11 = vmul.f32 %v1047_v9, %v148_v7  ;;  %v1365_v12 = vmul.f32 %v1042_v10, %v147_v8  ;;  %v170_v9 = vld [vmem:[%s3342_s1 + $0x4f8] sm:$0xff]  ;;  %v169_v10 = vld [vmem:[%s3342_s1 + $0x4f0] sm:$0xff] }
 0x194   :  { %1541 = vst.msk [vmem:[%s3343_s2 + $0x448] sm:$0xff] %vm1403_vm0, %v1366_v11  ;;  %1540 = vst.msk [vmem:[%s3343_s2 + $0x440] sm:$0xff] %vm1403_vm0, %v1365_v12 }
 0x195   :  { %v1057_v15 = vpop.permute.xlu1 %1056  ;;  %v1052_v16 = vpop.permute.xlu0 %1051 }
 0x196   :  { %v1368_v17 = vmul.f32 %v1057_v15, %v150_v13  ;;  %v1367_v18 = vmul.f32 %v1052_v16, %v149_v14  ;;  %v172_v15 = vld [vmem:[%s3342_s1 + $0x508] sm:$0xff]  ;;  %v171_v16 = vld [vmem:[%s3342_s1 + $0x500] sm:$0xff] }
 0x198   :  { %1543 = vst.msk [vmem:[%s3343_s2 + $0x458] sm:$0xff] %vm1403_vm0, %v1368_v17  ;;  %1542 = vst.msk [vmem:[%s3343_s2 + $0x450] sm:$0xff] %vm1403_vm0, %v1367_v18 }
 0x199   :  { %v1067_v21 = vpop.permute.xlu1 %1066  ;;  %v1062_v22 = vpop.permute.xlu0 %1061 }
 0x19a   :  { %v1370_v23 = vmul.f32 %v1067_v21, %v152_v19  ;;  %v1369_v24 = vmul.f32 %v1062_v22, %v151_v20  ;;  %v174_v21 = vld [vmem:[%s3342_s1 + $0x518] sm:$0xff]  ;;  %v173_v22 = vld [vmem:[%s3342_s1 + $0x510] sm:$0xff] }
 0x19c   :  { %1545 = vst.msk [vmem:[%s3343_s2 + $0x468] sm:$0xff] %vm1403_vm0, %v1370_v23  ;;  %1544 = vst.msk [vmem:[%s3343_s2 + $0x460] sm:$0xff] %vm1403_vm0, %v1369_v24 }
 0x19d   :  { %v1077_v27 = vpop.permute.xlu1 %1076  ;;  %v1072_v28 = vpop.permute.xlu0 %1071 }
 0x19e   :  { %v1372_v29 = vmul.f32 %v1077_v27, %v154_v25  ;;  %v1371_v30 = vmul.f32 %v1072_v28, %v153_v26  ;;  %v176_v27 = vld [vmem:[%s3342_s1 + $0x528] sm:$0xff]  ;;  %v175_v28 = vld [vmem:[%s3342_s1 + $0x520] sm:$0xff] }
 0x1a0   :  { %1547 = vst.msk [vmem:[%s3343_s2 + $0x478] sm:$0xff] %vm1403_vm0, %v1372_v29  ;;  %1546 = vst.msk [vmem:[%s3343_s2 + $0x470] sm:$0xff] %vm1403_vm0, %v1371_v30 }
 0x1a1   :  { %v1087_v33 = vpop.permute.xlu1 %1086  ;;  %v1082_v34 = vpop.permute.xlu0 %1081 }
 0x1a2   :  { %v1374_v35 = vmul.f32 %v1087_v33, %v156_v31  ;;  %v1373_v36 = vmul.f32 %v1082_v34, %v155_v32  ;;  %v178_v33 = vld [vmem:[%s3342_s1 + $0x538] sm:$0xff]  ;;  %v177_v34 = vld [vmem:[%s3342_s1 + $0x530] sm:$0xff] }
 0x1a4   :  { %1549 = vst.msk [vmem:[%s3343_s2 + $0x488] sm:$0xff] %vm1403_vm0, %v1374_v35  ;;  %1548 = vst.msk [vmem:[%s3343_s2 + $0x480] sm:$0xff] %vm1403_vm0, %v1373_v36 }
 0x1a5   :  { %v1097_v39 = vpop.permute.xlu1 %1096  ;;  %v1092_v40 = vpop.permute.xlu0 %1091 }
 0x1a6   :  { %v1376_v41 = vmul.f32 %v1097_v39, %v158_v37  ;;  %v1375_v42 = vmul.f32 %v1092_v40, %v157_v38  ;;  %v180_v39 = vld [vmem:[%s3342_s1 + $0x548] sm:$0xff]  ;;  %v179_v40 = vld [vmem:[%s3342_s1 + $0x540] sm:$0xff] }
 0x1a8   :  { %1551 = vst.msk [vmem:[%s3343_s2 + $0x498] sm:$0xff] %vm1403_vm0, %v1376_v41  ;;  %1550 = vst.msk [vmem:[%s3343_s2 + $0x490] sm:$0xff] %vm1403_vm0, %v1375_v42 }
 0x1a9   :  { %v1107_v45 = vpop.permute.xlu1 %1106  ;;  %v1102_v46 = vpop.permute.xlu0 %1101 }
 0x1aa   :  { %v1378_v47 = vmul.f32 %v1107_v45, %v160_v43  ;;  %v1377_v48 = vmul.f32 %v1102_v46, %v159_v44  ;;  %v182_v45 = vld [vmem:[%s3342_s1 + $0x558] sm:$0xff]  ;;  %v181_v46 = vld [vmem:[%s3342_s1 + $0x550] sm:$0xff] }
 0x1ac   :  { %1553 = vst.msk [vmem:[%s3343_s2 + $0x4a8] sm:$0xff] %vm1403_vm0, %v1378_v47  ;;  %1552 = vst.msk [vmem:[%s3343_s2 + $0x4a0] sm:$0xff] %vm1403_vm0, %v1377_v48 }
 0x1ad   :  { %v1117_v51 = vpop.permute.xlu1 %1116  ;;  %v1112_v52 = vpop.permute.xlu0 %1111 }
 0x1ae   :  { %v1380_v53 = vmul.f32 %v1117_v51, %v162_v49  ;;  %v1379_v54 = vmul.f32 %v1112_v52, %v161_v50  ;;  %v184_v51 = vld [vmem:[%s3342_s1 + $0x568] sm:$0xff]  ;;  %v183_v52 = vld [vmem:[%s3342_s1 + $0x560] sm:$0xff] }
 0x1b0   :  { %1555 = vst.msk [vmem:[%s3343_s2 + $0x4b8] sm:$0xff] %vm1403_vm0, %v1380_v53  ;;  %1554 = vst.msk [vmem:[%s3343_s2 + $0x4b0] sm:$0xff] %vm1403_vm0, %v1379_v54 }
 0x1b1   :  { %v1127_v57 = vpop.permute.xlu1 %1126  ;;  %v1122_v58 = vpop.permute.xlu0 %1121 }
 0x1b2   :  { %v1382_v59 = vmul.f32 %v1127_v57, %v164_v55  ;;  %v1381_v60 = vmul.f32 %v1122_v58, %v163_v56 }
 0x1b4   :  { %1557 = vst.msk [vmem:[%s3343_s2 + $0x4c8] sm:$0xff] %vm1403_vm0, %v1382_v59  ;;  %1556 = vst.msk [vmem:[%s3343_s2 + $0x4c0] sm:$0xff] %vm1403_vm0, %v1381_v60 }
 0x1b5   :  { %v1137_v63 = vpop.permute.xlu1 %1136  ;;  %v1132_v0 = vpop.permute.xlu0 %1131 }
 0x1b6   :  { %v1384_v1 = vmul.f32 %v1137_v63, %v166_v61  ;;  %v1383_v2 = vmul.f32 %v1132_v0, %v165_v62 }
 0x1b8   :  { %1559 = vst.msk [vmem:[%s3343_s2 + $0x4d8] sm:$0xff] %vm1403_vm0, %v1384_v1  ;;  %1558 = vst.msk [vmem:[%s3343_s2 + $0x4d0] sm:$0xff] %vm1403_vm0, %v1383_v2 }
 0x1b9   :  { %v1147_v5 = vpop.permute.xlu1 %1146  ;;  %v1142_v6 = vpop.permute.xlu0 %1141 }
 0x1ba   :  { %v1386_v7 = vmul.f32 %v1147_v5, %v168_v3  ;;  %v1385_v8 = vmul.f32 %v1142_v6, %v167_v4 }
 0x1bc   :  { %1561 = vst.msk [vmem:[%s3343_s2 + $0x4e8] sm:$0xff] %vm1403_vm0, %v1386_v7  ;;  %1560 = vst.msk [vmem:[%s3343_s2 + $0x4e0] sm:$0xff] %vm1403_vm0, %v1385_v8 }
 0x1bd   :  { %v1157_v11 = vpop.permute.xlu1 %1156  ;;  %v1152_v12 = vpop.permute.xlu0 %1151 }
 0x1be   :  { %v1388_v13 = vmul.f32 %v1157_v11, %v170_v9  ;;  %v1387_v14 = vmul.f32 %v1152_v12, %v169_v10 }
 0x1c0   :  { %1563 = vst.msk [vmem:[%s3343_s2 + $0x4f8] sm:$0xff] %vm1403_vm0, %v1388_v13  ;;  %1562 = vst.msk [vmem:[%s3343_s2 + $0x4f0] sm:$0xff] %vm1403_vm0, %v1387_v14 }
 0x1c1   :  { %v1167_v17 = vpop.permute.xlu1 %1166  ;;  %v1162_v18 = vpop.permute.xlu0 %1161 }
 0x1c2   :  { %v1390_v19 = vmul.f32 %v1167_v17, %v172_v15  ;;  %v1389_v20 = vmul.f32 %v1162_v18, %v171_v16 }
 0x1c4   :  { %1565 = vst.msk [vmem:[%s3343_s2 + $0x508] sm:$0xff] %vm1403_vm0, %v1390_v19  ;;  %1564 = vst.msk [vmem:[%s3343_s2 + $0x500] sm:$0xff] %vm1403_vm0, %v1389_v20 }
 0x1c5   :  { %v1177_v23 = vpop.permute.xlu1 %1176  ;;  %v1172_v24 = vpop.permute.xlu0 %1171 }
 0x1c6   :  { %v1392_v25 = vmul.f32 %v1177_v23, %v174_v21  ;;  %v1391_v26 = vmul.f32 %v1172_v24, %v173_v22 }
 0x1c8   :  { %1567 = vst.msk [vmem:[%s3343_s2 + $0x518] sm:$0xff] %vm1403_vm0, %v1392_v25  ;;  %1566 = vst.msk [vmem:[%s3343_s2 + $0x510] sm:$0xff] %vm1403_vm0, %v1391_v26 }
 0x1c9   :  { %v1187_v29 = vpop.permute.xlu1 %1186  ;;  %v1182_v30 = vpop.permute.xlu0 %1181 }
 0x1ca   :  { %v1394_v31 = vmul.f32 %v1187_v29, %v176_v27  ;;  %v1393_v32 = vmul.f32 %v1182_v30, %v175_v28 }
 0x1cc   :  { %1569 = vst.msk [vmem:[%s3343_s2 + $0x528] sm:$0xff] %vm1403_vm0, %v1394_v31  ;;  %1568 = vst.msk [vmem:[%s3343_s2 + $0x520] sm:$0xff] %vm1403_vm0, %v1393_v32 }
 0x1cd   :  { %v1197_v35 = vpop.permute.xlu1 %1196  ;;  %v1192_v36 = vpop.permute.xlu0 %1191 }
 0x1ce   :  { %v1396_v37 = vmul.f32 %v1197_v35, %v178_v33  ;;  %v1395_v38 = vmul.f32 %v1192_v36, %v177_v34 }
 0x1d0   :  { %1571 = vst.msk [vmem:[%s3343_s2 + $0x538] sm:$0xff] %vm1403_vm0, %v1396_v37  ;;  %1570 = vst.msk [vmem:[%s3343_s2 + $0x530] sm:$0xff] %vm1403_vm0, %v1395_v38 }
 0x1d1   :  { %v1207_v41 = vpop.permute.xlu1 %1206  ;;  %v1202_v42 = vpop.permute.xlu0 %1201 }
 0x1d2   :  { %v1398_v43 = vmul.f32 %v1207_v41, %v180_v39  ;;  %v1397_v44 = vmul.f32 %v1202_v42, %v179_v40 }
 0x1d4   :  { %1573 = vst.msk [vmem:[%s3343_s2 + $0x548] sm:$0xff] %vm1403_vm0, %v1398_v43  ;;  %1572 = vst.msk [vmem:[%s3343_s2 + $0x540] sm:$0xff] %vm1403_vm0, %v1397_v44 }
 0x1d5   :  { %v1217_v47 = vpop.permute.xlu1 %1216  ;;  %v1212_v48 = vpop.permute.xlu0 %1211 }
 0x1d6   :  { %v1400_v49 = vmul.f32 %v1217_v47, %v182_v45  ;;  %v1399_v50 = vmul.f32 %v1212_v48, %v181_v46 }
 0x1d8   :  { %1575 = vst.msk [vmem:[%s3343_s2 + $0x558] sm:$0xff] %vm1403_vm0, %v1400_v49  ;;  %1574 = vst.msk [vmem:[%s3343_s2 + $0x550] sm:$0xff] %vm1403_vm0, %v1399_v50 }
 0x1d9   :  { %v1227_v53 = vpop.permute.xlu1 %1226  ;;  %v1222_v54 = vpop.permute.xlu0 %1221 }
 0x1da   :  { %v1402_v55 = vmul.f32 %v1227_v53, %v184_v51  ;;  %v1401_v56 = vmul.f32 %v1222_v54, %v183_v52 }
 0x1dc   :  { %1577 = vst.msk [vmem:[%s3343_s2 + $0x568] sm:$0xff] %vm1403_vm0, %v1402_v55  ;;  %1576 = vst.msk [vmem:[%s3343_s2 + $0x560] sm:$0xff] %vm1403_vm0, %v1401_v56 }

</bundles_post_ra>
